<compile_context>
chip_gen: v7x
topology: tpu7x:2x2x1
jax: 0.10.0
libtpu: 0.0.40
codegen_flags: <defaults>
</compile_context>

<pallas_src>
import jax
import jax.numpy as jnp
from jax import lax
from jax.experimental import pallas as pl
from jax.experimental.pallas import tpu as pltpu


def transformer_kernel(
    emb_ref,   # (TB, S1, H)  embedded tokens (BOS prepended), compute dtype
    wq_ref,    # (H, D)       compute dtype
    wk_ref,    # (H, D)
    wv_ref,    # (H, D)
    wo_ref,    # (D, H)       head_dim_mask already folded into rows
    w1_ref,    # (H, H)
    b1_ref,    # (1, H)       f32
    w2_ref,    # (H, H)
    b2_ref,    # (1, H)       f32
    wu_ref,    # (H, Vpad)    zero-padded to lane-dense width
    bu_ref,    # (1, Vpad)    f32
    out_ref,   # (TB, Vpad)   f32
):
    x = emb_ref[...]                                   # (TB, S1, H)
    cdt = x.dtype                                      # matmul-operand dtype (bf16 or f32)
    D = wq_ref.shape[1]
    inv_sqrt_d = 1.0 / (D ** 0.5)

    # --- K / V for all positions: 3-D contractions on the MXU, no S1-unaligned reshape ----
    k = lax.dot_general(x, wk_ref[...], (((2,), (0,)), ((), ())),
                        preferred_element_type=jnp.float32)          # (TB, S1, D) f32
    v = lax.dot_general(x, wv_ref[...], (((2,), (0,)), ((), ())),
                        preferred_element_type=jnp.float32)          # (TB, S1, D) f32

    # --- only the CLS row (position 0) is consumed downstream ------------------------------
    x_cls = x[:, 0, :]                                               # (TB, H) compute dtype
    q = jnp.dot(x_cls, wq_ref[...], preferred_element_type=jnp.float32)   # (TB, D) f32

    # scores of the CLS query against all keys; stable softmax, f32 throughout (v5e-safe)
    scores = jnp.sum(q[:, None, :] * k, axis=-1) * inv_sqrt_d        # (TB, S1)
    scores = scores - jnp.max(scores, axis=-1, keepdims=True)
    p = jnp.exp(scores)                                              # (TB, S1)
    denom = jnp.sum(p, axis=-1, keepdims=True)                       # (TB, 1)

    # deferred normalization: unnormalized weighted sum, then scale the (TB, D) result
    h = jnp.sum(p[:, :, None] * v, axis=1)                           # (TB, D) f32
    h = h * pl.reciprocal(denom)                                     # exact; keeps 1e-4 tol

    x_cls_f32 = x_cls.astype(jnp.float32)
    att = jnp.dot(h.astype(cdt), wo_ref[...], preferred_element_type=jnp.float32)  # (TB, H)
    y = att + x_cls_f32                                              # residual 1 (f32)

    # --- MLP on the CLS row only ------------------------------------------------------------
    hid = jnp.dot(y.astype(cdt), w1_ref[...], preferred_element_type=jnp.float32) + b1_ref[...]
    hid = jnp.maximum(hid, 0.0)
    mlp = jnp.dot(hid.astype(cdt), w2_ref[...], preferred_element_type=jnp.float32) + b2_ref[...]
    y = mlp + y                                                      # residual 2 (f32)

    # --- unembedding (lane-dense padded width -> unmasked vst) -------------------------------
    logits = jnp.dot(y.astype(cdt), wu_ref[...], preferred_element_type=jnp.float32) + bu_ref[...]
    out_ref[...] = logits


def prepare_params(params, *, head_dim, hidden_dim, vocab_size,
                   head_dim_mask=None, compute_dtype=jnp.bfloat16):
    """One-time weight prep (call at parameter load, NOT per forward):
    head_dim_mask folded into w_o, unembedding zero-padded to a multiple of 128 lanes,
    matmul weights + embedding table cast to the compute dtype, biases kept f32."""
    V1 = vocab_size + 1
    Vpad = pl.cdiv(V1, 128) * 128
    cdt = jnp.dtype(compute_dtype)

    if head_dim_mask is None:
        head_dim_mask = jnp.ones((head_dim,), dtype=jnp.float32)
    wo = params["wo"].astype(jnp.float32) * head_dim_mask.astype(jnp.float32)[:, None]

    wu_pad = jnp.zeros((hidden_dim, Vpad), jnp.float32).at[:, :V1].set(
        params["wu"].astype(jnp.float32))
    bu_pad = jnp.zeros((1, Vpad), jnp.float32).at[:, :V1].set(
        params["bu"].astype(jnp.float32))

    return {
        "embedding": params["embedding"].astype(cdt),
        "wq": params["wq"].astype(cdt),
        "wk": params["wk"].astype(cdt),
        "wv": params["wv"].astype(cdt),
        "wo": wo.astype(cdt),
        "w1": params["w1"].astype(cdt),
        "b1": params["b1"].astype(jnp.float32),
        "w2": params["w2"].astype(cdt),
        "b2": params["b2"].astype(jnp.float32),
        "wu": wu_pad.astype(cdt),
        "bu": bu_pad,
        "v1": V1,
    }


def single_head_transformer(tokens, prepared, *, block_b=None):
    """tokens: (B, S) int32 in [0, vocab_size).  Returns (B, vocab_size + 1) f32."""
    B, S = tokens.shape
    S1 = S + 1
    emb_table = prepared["embedding"]
    H = emb_table.shape[1]
    Vpad = prepared["wu"].shape[1]
    V1 = prepared["v1"]

    # TODO(synk): BOS concat + dynamic token-id embedding gather stay in plain JAX; a dynamic
    # vocab gather has no clean Pallas TPU expression at this scale.
    bos = jnp.full((B, 1), 2, dtype=jnp.int32)
    tok_full = jnp.concatenate([bos, tokens.astype(jnp.int32)], axis=1)  # (B, S+1)
    emb = emb_table[tok_full]                                            # (B, S+1, H) compute dt

    # --- batch tile: >=2 grid steps when possible (megacore sharding + double-buffered DMA),
    #     sublane-legal (multiple of 8 unless the block covers the whole batch). -------------
    if block_b is not None:
        tb = int(block_b)
    elif B >= 16:
        tb = min(128, max(8, ((B // 2) // 8) * 8))
    else:
        tb = B
    tb = min(tb, B)
    if tb < B and tb % 8 != 0:
        tb = max(8, (tb // 8) * 8)           # clamp user block_b to a sublane-legal tile
    b_pad = pl.cdiv(B, tb) * tb
    if b_pad != B:
        emb = jnp.pad(emb, ((0, b_pad - B), (0, 0), (0, 0)))   # zero rows; sliced off below
    grid = (b_pad // tb,)

    weights = (prepared["wq"], prepared["wk"], prepared["wv"], prepared["wo"],
               prepared["w1"], prepared["b1"], prepared["w2"], prepared["b2"],
               prepared["wu"], prepared["bu"])

    def _replicated_spec(a):
        return pl.BlockSpec(a.shape, lambda i, _z=(0,) * a.ndim: _z)

    in_specs = [pl.BlockSpec((tb, S1, H), lambda i: (i, 0, 0))]
    in_specs += [_replicated_spec(a) for a in weights]           # length matches inputs

    # VMEM budget: double-buffered emb/out blocks + (double-buffered) resident weights
    # + compiler scratch margin.  Capped at 64 MiB (v7x physical); explicit so v5e's
    # 16 MiB scoped default is lifted without relying on XLA flags.
    # TODO(synk): at large vocab (Vpad >> 128) add an "arbitrary" grid axis over wu column
    # tiles so the unembedding streams through VMEM instead of residing whole.
    emb_block_bytes = tb * S1 * H * emb.dtype.itemsize
    out_block_bytes = tb * Vpad * 4
    weight_bytes = sum(int(a.size) * a.dtype.itemsize for a in weights)
    vmem_needed = 2 * (emb_block_bytes + out_block_bytes + weight_bytes) + (4 << 20)
    vmem_limit = int(min(64 << 20, max(32 << 20, vmem_needed)))

    logits_pad = pl.pallas_call(
        transformer_kernel,
        out_shape=jax.ShapeDtypeStruct((b_pad, Vpad), jnp.float32),
        grid=grid,
        in_specs=in_specs,
        out_specs=pl.BlockSpec((tb, Vpad), lambda i: (i, 0)),
        compiler_params=pltpu.CompilerParams(
            dimension_semantics=("parallel",),
            vmem_limit_bytes=vmem_limit,
        ),
    )(emb, *weights)

    return logits_pad[:B, :V1]


def _reference(tokens, params, *, head_dim, vocab_size):
    """Pure-JAX f32 reference mirroring the PyTorch forward (sanity check)."""
    B = tokens.shape[0]
    bos = jnp.full((B, 1), 2, dtype=jnp.int32)
    tok_full = jnp.concatenate([bos, tokens.astype(jnp.int32)], axis=1)
    x = params["embedding"][tok_full]
    q = x @ params["wq"]
    k = x @ params["wk"]
    v = x @ params["wv"]
    a = jax.nn.softmax(q @ jnp.swapaxes(k, -1, -2) / (head_dim ** 0.5), axis=-1)
    h = a @ v                                           # head_dim_mask == ones -> no-op
    y = h @ params["wo"] + x
    m = jnp.maximum(y @ params["w1"] + params["b1"][0], 0.0) @ params["w2"] + params["b2"][0]
    y = m + y
    return y[:, 0, :] @ params["wu"] + params["bu"][0]


if __name__ == "__main__":
    # small, module-consistent shapes; batch chosen so the kernel exercises a >=2-step grid
    vocab_size = 16
    head_dim = 8
    hidden_dim = 32
    batch, seq = 16, 8
    V1 = vocab_size + 1

    key = jax.random.PRNGKey(0)
    keys = jax.random.split(key, 12)

    def init(k, shape, scale=0.1):
        return (scale * jax.random.normal(k, shape)).astype(jnp.float32)

    params = {
        "embedding": init(keys[0], (V1, hidden_dim)),
        "wq": init(keys[1], (hidden_dim, head_dim)),
        "wk": init(keys[2], (hidden_dim, head_dim)),
        "wv": init(keys[3], (hidden_dim, head_dim)),
        "wo": init(keys[4], (head_dim, hidden_dim)),
        "w1": init(keys[5], (hidden_dim, hidden_dim)),
        "b1": init(keys[6], (1, hidden_dim)),
        "w2": init(keys[7], (hidden_dim, hidden_dim)),
        "b2": init(keys[8], (1, hidden_dim)),
        "wu": init(keys[9], (hidden_dim, V1)),
        "bu": init(keys[10], (1, V1)),
    }

    tokens = jax.random.randint(keys[11], (batch, seq), 0, vocab_size, dtype=jnp.int32)

    # exact path (f32 operands) -- tight tolerance against the pure-JAX reference
    prep_f32 = prepare_params(params, head_dim=head_dim, hidden_dim=hidden_dim,
                              vocab_size=vocab_size, compute_dtype=jnp.float32)
    out_f32 = jax.block_until_ready(single_head_transformer(tokens, prep_f32))

    # bf16 data-movement path (matmul operands bf16, f32 accumulation / softmax / residuals)
    prep_bf16 = prepare_params(params, head_dim=head_dim, hidden_dim=hidden_dim,
                               vocab_size=vocab_size, compute_dtype=jnp.bfloat16)
    out_bf16 = jax.block_until_ready(single_head_transformer(tokens, prep_bf16))

    ref = _reference(tokens, params, head_dim=head_dim, vocab_size=vocab_size)
    assert out_f32.shape == (batch, V1)
    assert out_bf16.shape == (batch, V1)
    assert jnp.allclose(out_f32, ref, atol=1e-4, rtol=1e-4)
    assert jnp.allclose(out_bf16, ref, atol=3e-2, rtol=3e-2)

    print("KERNEL_OK")
</pallas_src>

<mosaic_0001>
module attributes {stable_mosaic.version = 11 : i64} {
  func.func @transformer_kernel(%arg0: i32, %arg1: memref<8x9x32xf32, #tpu.memory_space<vmem>>, %arg2: memref<32x8xf32, #tpu.memory_space<vmem>>, %arg3: memref<32x8xf32, #tpu.memory_space<vmem>>, %arg4: memref<32x8xf32, #tpu.memory_space<vmem>>, %arg5: memref<8x32xf32, #tpu.memory_space<vmem>>, %arg6: memref<32x32xf32, #tpu.memory_space<vmem>>, %arg7: memref<1x32xf32, #tpu.memory_space<vmem>>, %arg8: memref<32x32xf32, #tpu.memory_space<vmem>>, %arg9: memref<1x32xf32, #tpu.memory_space<vmem>>, %arg10: memref<32x128xf32, #tpu.memory_space<vmem>>, %arg11: memref<1x128xf32, #tpu.memory_space<vmem>>, %arg12: memref<8x128xf32, #tpu.memory_space<vmem>>) attributes {dimension_semantics = [#tpu.dimension_semantics<parallel>], iteration_bounds = array<i64: 2>, scalar_prefetch = 0 : i64, scratch_operands = 0 : i64, tpu.core_type = #tpu.core_type<tc>, window_params = [{transform_indices = @transform_0, window_bounds = array<i64: 8, 9, 32>}, {pipeline_mode = #tpu.pipeline_mode<synchronous>, transform_indices = @transform_1, window_bounds = array<i64: 32, 8>}, {pipeline_mode = #tpu.pipeline_mode<synchronous>, transform_indices = @transform_2, window_bounds = array<i64: 32, 8>}, {pipeline_mode = #tpu.pipeline_mode<synchronous>, transform_indices = @transform_3, window_bounds = array<i64: 32, 8>}, {pipeline_mode = #tpu.pipeline_mode<synchronous>, transform_indices = @transform_4, window_bounds = array<i64: 8, 32>}, {pipeline_mode = #tpu.pipeline_mode<synchronous>, transform_indices = @transform_5, window_bounds = array<i64: 32, 32>}, {pipeline_mode = #tpu.pipeline_mode<synchronous>, transform_indices = @transform_6, window_bounds = array<i64: 1, 32>}, {pipeline_mode = #tpu.pipeline_mode<synchronous>, transform_indices = @transform_7, window_bounds = array<i64: 32, 32>}, {pipeline_mode = #tpu.pipeline_mode<synchronous>, transform_indices = @transform_8, window_bounds = array<i64: 1, 32>}, {pipeline_mode = #tpu.pipeline_mode<synchronous>, transform_indices = @transform_9, window_bounds = array<i64: 32, 128>}, {pipeline_mode = #tpu.pipeline_mode<synchronous>, transform_indices = @transform_10, window_bounds = array<i64: 1, 128>}, {transform_indices = @transform_11, window_bounds = array<i64: 8, 128>}]} {
    %c0 = arith.constant 0 : index
    %c0_0 = arith.constant 0 : index
    %c0_1 = arith.constant 0 : index
    %0 = vector.load %arg1[%c0, %c0_0, %c0_1] : memref<8x9x32xf32, #tpu.memory_space<vmem>>, vector<8x9x32xf32>
    %c0_2 = arith.constant 0 : index
    %c0_3 = arith.constant 0 : index
    %1 = vector.load %arg3[%c0_2, %c0_3] : memref<32x8xf32, #tpu.memory_space<vmem>>, vector<32x8xf32>
    %cst = arith.constant dense<0.000000e+00> : vector<8x9x8xf32>
    %2 = tpu.matmul %0, %1, %cst {dimension_numbers = #tpu.dot_dimension_numbers<[2], [0], [0, 1], [1], [0, 0, 0, 1, 1, 1], [], []>} : vector<8x9x32xf32>, vector<32x8xf32>, vector<8x9x8xf32> -> vector<8x9x8xf32>
    %c0_4 = arith.constant 0 : index
    %c0_5 = arith.constant 0 : index
    %3 = vector.load %arg4[%c0_4, %c0_5] : memref<32x8xf32, #tpu.memory_space<vmem>>, vector<32x8xf32>
    %cst_6 = arith.constant dense<0.000000e+00> : vector<8x9x8xf32>
    %4 = tpu.matmul %0, %3, %cst_6 {dimension_numbers = #tpu.dot_dimension_numbers<[2], [0], [0, 1], [1], [0, 0, 0, 1, 1, 1], [], []>} : vector<8x9x32xf32>, vector<32x8xf32>, vector<8x9x8xf32> -> vector<8x9x8xf32>
    %5 = vector.extract_strided_slice %0 {offsets = [0, 0, 0], sizes = [8, 1, 32], strides = [1, 1, 1]} : vector<8x9x32xf32> to vector<8x1x32xf32>
    %6 = vector.shape_cast %5 : vector<8x1x32xf32> to vector<8x32xf32>
    %c0_7 = arith.constant 0 : index
    %c0_8 = arith.constant 0 : index
    %7 = vector.load %arg2[%c0_7, %c0_8] : memref<32x8xf32, #tpu.memory_space<vmem>>, vector<32x8xf32>
    %cst_9 = arith.constant dense<0.000000e+00> : vector<8x8xf32>
    %8 = tpu.matmul %6, %7, %cst_9 {dimension_numbers = #tpu.dot_dimension_numbers<[1], [0], [0], [1], [0, 0, 1, 1], [], []>} : vector<8x32xf32>, vector<32x8xf32>, vector<8x8xf32> -> vector<8x8xf32>
    %9 = vector.shape_cast %8 : vector<8x8xf32> to vector<8x1x8xf32>
    %10 = vector.broadcast %9 : vector<8x1x8xf32> to vector<8x9x8xf32>
    %11 = arith.mulf %10, %2 : vector<8x9x8xf32>
    %cst_10 = arith.constant dense<0.000000e+00> : vector<8x9xf32>
    %12 = vector.multi_reduction <add>, %11, %cst_10 [2] : vector<8x9x8xf32> to vector<8x9xf32>
    %cst_11 = arith.constant 0.353553385 : f32
    %13 = vector.broadcast %cst_11 : f32 to vector<8x9xf32>
    %14 = arith.mulf %12, %13 : vector<8x9xf32>
    %cst_12 = arith.constant dense<0xFF800000> : vector<8xf32>
    %15 = vector.multi_reduction <maximumf>, %14, %cst_12 [1] : vector<8x9xf32> to vector<8xf32>
    %16 = vector.shape_cast %15 : vector<8xf32> to vector<8x1xf32>
    %17 = vector.broadcast %16 : vector<8x1xf32> to vector<8x9xf32>
    %18 = arith.subf %14, %17 : vector<8x9xf32>
    %19 = math.exp %18 : vector<8x9xf32>
    %cst_13 = arith.constant dense<0.000000e+00> : vector<8xf32>
    %20 = vector.multi_reduction <add>, %19, %cst_13 [1] : vector<8x9xf32> to vector<8xf32>
    %21 = vector.shape_cast %20 : vector<8xf32> to vector<8x1xf32>
    %22 = vector.shape_cast %19 : vector<8x9xf32> to vector<8x9x1xf32>
    %23 = vector.broadcast %22 : vector<8x9x1xf32> to vector<8x9x8xf32>
    %24 = arith.mulf %23, %4 : vector<8x9x8xf32>
    %cst_14 = arith.constant dense<0.000000e+00> : vector<8x8xf32>
    %25 = vector.multi_reduction <add>, %24, %cst_14 [1] : vector<8x9x8xf32> to vector<8x8xf32>
    %26 = tpu.reciprocal %21 : vector<8x1xf32> -> vector<8x1xf32>
    %27 = vector.broadcast %26 : vector<8x1xf32> to vector<8x8xf32>
    %28 = arith.mulf %25, %27 : vector<8x8xf32>
    %c0_15 = arith.constant 0 : index
    %c0_16 = arith.constant 0 : index
    %29 = vector.load %arg5[%c0_15, %c0_16] : memref<8x32xf32, #tpu.memory_space<vmem>>, vector<8x32xf32>
    %cst_17 = arith.constant dense<0.000000e+00> : vector<8x32xf32>
    %30 = tpu.matmul %28, %29, %cst_17 {dimension_numbers = #tpu.dot_dimension_numbers<[1], [0], [0], [1], [0, 0, 1, 1], [], []>} : vector<8x8xf32>, vector<8x32xf32>, vector<8x32xf32> -> vector<8x32xf32>
    %31 = arith.addf %30, %6 : vector<8x32xf32>
    %c0_18 = arith.constant 0 : index
    %c0_19 = arith.constant 0 : index
    %32 = vector.load %arg6[%c0_18, %c0_19] : memref<32x32xf32, #tpu.memory_space<vmem>>, vector<32x32xf32>
    %cst_20 = arith.constant dense<0.000000e+00> : vector<8x32xf32>
    %33 = tpu.matmul %31, %32, %cst_20 {dimension_numbers = #tpu.dot_dimension_numbers<[1], [0], [0], [1], [0, 0, 1, 1], [], []>} : vector<8x32xf32>, vector<32x32xf32>, vector<8x32xf32> -> vector<8x32xf32>
    %c0_21 = arith.constant 0 : index
    %c0_22 = arith.constant 0 : index
    %34 = vector.load %arg7[%c0_21, %c0_22] : memref<1x32xf32, #tpu.memory_space<vmem>>, vector<1x32xf32>
    %35 = vector.broadcast %34 : vector<1x32xf32> to vector<8x32xf32>
    %36 = arith.addf %33, %35 : vector<8x32xf32>
    %cst_23 = arith.constant 0.000000e+00 : f32
    %37 = vector.broadcast %cst_23 : f32 to vector<8x32xf32>
    %38 = arith.maximumf %36, %37 : vector<8x32xf32>
    %c0_24 = arith.constant 0 : index
    %c0_25 = arith.constant 0 : index
    %39 = vector.load %arg8[%c0_24, %c0_25] : memref<32x32xf32, #tpu.memory_space<vmem>>, vector<32x32xf32>
    %cst_26 = arith.constant dense<0.000000e+00> : vector<8x32xf32>
    %40 = tpu.matmul %38, %39, %cst_26 {dimension_numbers = #tpu.dot_dimension_numbers<[1], [0], [0], [1], [0, 0, 1, 1], [], []>} : vector<8x32xf32>, vector<32x32xf32>, vector<8x32xf32> -> vector<8x32xf32>
    %c0_27 = arith.constant 0 : index
    %c0_28 = arith.constant 0 : index
    %41 = vector.load %arg9[%c0_27, %c0_28] : memref<1x32xf32, #tpu.memory_space<vmem>>, vector<1x32xf32>
    %42 = vector.broadcast %41 : vector<1x32xf32> to vector<8x32xf32>
    %43 = arith.addf %40, %42 : vector<8x32xf32>
    %44 = arith.addf %43, %31 : vector<8x32xf32>
    %c0_29 = arith.constant 0 : index
    %c0_30 = arith.constant 0 : index
    %45 = vector.load %arg10[%c0_29, %c0_30] : memref<32x128xf32, #tpu.memory_space<vmem>>, vector<32x128xf32>
    %cst_31 = arith.constant dense<0.000000e+00> : vector<8x128xf32>
    %46 = tpu.matmul %44, %45, %cst_31 {dimension_numbers = #tpu.dot_dimension_numbers<[1], [0], [0], [1], [0, 0, 1, 1], [], []>} : vector<8x32xf32>, vector<32x128xf32>, vector<8x128xf32> -> vector<8x128xf32>
    %c0_32 = arith.constant 0 : index
    %c0_33 = arith.constant 0 : index
    %47 = vector.load %arg11[%c0_32, %c0_33] : memref<1x128xf32, #tpu.memory_space<vmem>>, vector<1x128xf32>
    %48 = vector.broadcast %47 : vector<1x128xf32> to vector<8x128xf32>
    %49 = arith.addf %46, %48 : vector<8x128xf32>
    %c0_34 = arith.constant 0 : index
    %c0_35 = arith.constant 0 : index
    %50 = vector.load %arg12[%c0_34, %c0_35] : memref<8x128xf32, #tpu.memory_space<vmem>>, vector<8x128xf32>
    tpu.vector_store %arg12[%c0_34, %c0_35], %49 {strides = array<i32>} : memref<8x128xf32, #tpu.memory_space<vmem>>, vector<8x128xf32>,
    return
  }
  func.func @transform_0(%arg0: i32) -> (i32, i32, i32) {
    %c0_i32 = arith.constant 0 : i32
    %c0_i32_0 = arith.constant 0 : i32
    %c0_i32_1 = arith.constant 0 : i32
    return %arg0, %c0_i32, %c0_i32_0 : i32, i32, i32
  }
  func.func @transform_1(%arg0: i32) -> (i32, i32) {
    %c0_i32 = arith.constant 0 : i32
    %c0_i32_0 = arith.constant 0 : i32
    %c0_i32_1 = arith.constant 0 : i32
    return %c0_i32, %c0_i32_0 : i32, i32
  }
  func.func @transform_2(%arg0: i32) -> (i32, i32) {
    %c0_i32 = arith.constant 0 : i32
    %c0_i32_0 = arith.constant 0 : i32
    %c0_i32_1 = arith.constant 0 : i32
    return %c0_i32, %c0_i32_0 : i32, i32
  }
  func.func @transform_3(%arg0: i32) -> (i32, i32) {
    %c0_i32 = arith.constant 0 : i32
    %c0_i32_0 = arith.constant 0 : i32
    %c0_i32_1 = arith.constant 0 : i32
    return %c0_i32, %c0_i32_0 : i32, i32
  }
  func.func @transform_4(%arg0: i32) -> (i32, i32) {
    %c0_i32 = arith.constant 0 : i32
    %c0_i32_0 = arith.constant 0 : i32
    %c0_i32_1 = arith.constant 0 : i32
    return %c0_i32, %c0_i32_0 : i32, i32
  }
  func.func @transform_5(%arg0: i32) -> (i32, i32) {
    %c0_i32 = arith.constant 0 : i32
    %c0_i32_0 = arith.constant 0 : i32
    %c0_i32_1 = arith.constant 0 : i32
    return %c0_i32, %c0_i32_0 : i32, i32
  }
  func.func @transform_6(%arg0: i32) -> (i32, i32) {
    %c0_i32 = arith.constant 0 : i32
    %c0_i32_0 = arith.constant 0 : i32
    %c0_i32_1 = arith.constant 0 : i32
    return %c0_i32, %c0_i32_0 : i32, i32
  }
  func.func @transform_7(%arg0: i32) -> (i32, i32) {
    %c0_i32 = arith.constant 0 : i32
    %c0_i32_0 = arith.constant 0 : i32
    %c0_i32_1 = arith.constant 0 : i32
    return %c0_i32, %c0_i32_0 : i32, i32
  }
  func.func @transform_8(%arg0: i32) -> (i32, i32) {
    %c0_i32 = arith.constant 0 : i32
    %c0_i32_0 = arith.constant 0 : i32
    %c0_i32_1 = arith.constant 0 : i32
    return %c0_i32, %c0_i32_0 : i32, i32
  }
  func.func @transform_9(%arg0: i32) -> (i32, i32) {
    %c0_i32 = arith.constant 0 : i32
    %c0_i32_0 = arith.constant 0 : i32
    %c0_i32_1 = arith.constant 0 : i32
    return %c0_i32, %c0_i32_0 : i32, i32
  }
  func.func @transform_10(%arg0: i32) -> (i32, i32) {
    %c0_i32 = arith.constant 0 : i32
    %c0_i32_0 = arith.constant 0 : i32
    %c0_i32_1 = arith.constant 0 : i32
    return %c0_i32, %c0_i32_0 : i32, i32
  }
  func.func @transform_11(%arg0: i32) -> (i32, i32) {
    %c0_i32 = arith.constant 0 : i32
    %c0_i32_0 = arith.constant 0 : i32
    return %arg0, %c0_i32 : i32, i32
  }
}

</mosaic_0001>

<bundles_post_ra>
// kernel: tpu_custom_call.1
= control target key start
LH: loop header
LB: loop body
LE: loop exit
PB: predicated region body
PF: predicated region fallthrough
CT: control target
= control target key end

     0   :  { %16 = vsyncpa [#allocation3], 0  ;;  %s6636_s0 = inlined_call_operand.vmem [shape: f32[16,9,32], index: 0, kind: input, shape index: {}]   ;;  %s6637_s1 = inlined_call_operand.vmem [shape: f32[32,8], index: 1, kind: input, shape index: {}]   ;;  %s6638_s2 = inlined_call_operand.vmem [shape: f32[32,8], index: 2, kind: input, shape index: {}]   ;;  %s6639_s3 = inlined_call_operand.vmem [shape: f32[32,8], index: 3, kind: input, shape index: {}]   ;;  %s6640_s4 = inlined_call_operand.vmem [shape: f32[8,32], index: 4, kind: input, shape index: {}]   ;;  %s6641_s5 = inlined_call_operand.vmem [shape: f32[32,32], index: 5, kind: input, shape index: {}]   ;;  %s6642_s6 = inlined_call_operand.vmem [shape: f32[1,32], index: 6, kind: input, shape index: {}]   ;;  %s6643_s7 = inlined_call_operand.vmem [shape: f32[32,32], index: 7, kind: input, shape index: {}]   ;;  %s6644_s8 = inlined_call_operand.vmem [shape: f32[1,32], index: 8, kind: input, shape index: {}]   ;;  %s6645_s9 = inlined_call_operand.vmem [shape: f32[32,128], index: 9, kind: input, shape index: {}]   ;;  %s6646_s10 = inlined_call_operand.vmem [shape: f32[1,128], index: 10, kind: input, shape index: {}]   ;;  %s6647_s11 = inlined_call_operand.hbm [shape: f32[16,128], index: 11, kind: output, shape index: {}]  }
   0x1   :  { %18 = vsyncpa [#allocation3 + $0x1], 0  ;;  %s5208_s17 = smov 0   ;;  %s5210_s18 = smov 0  }
   0x2   :  { %s5212_s19 = smov 0   ;;  %s5214_s20 = smov 0  }
   0x3 LB: > { %s5229_s21 = sadd.s32 4294967295, %s5140_s20   ;;  %s4716_s22 = sadd.s32 4294967294, %s5140_s20   ;;  %s5140_s20 = sphi %s5214_s20, %s6779_s20   ;;  %s5136_s19 = sphi %s5212_s19, %s6778_s19   ;;  %s5132_s18 = sphi %s5210_s18, %s6777_s18   ;;  %s5128_s17 = sphi %s5208_s17, %s6776_s17  }
   0x4   : > { %s5233_s23 = sadd.s32 1, %s5140_s20   ;;  %s267_s24 = sadd.s32 1, %s5136_s19 }
   0x5   : > { %s264_s25 = ssub.s32 %s5140_s20, %s5233_s23  ;;  %p277_p0 = scmp.ne.s32.totalorder %s5136_s19, %s5132_s18 }
   0x6   : > { %p265_p1 = scmp.eq.s32.totalorder %s264_s25, 0  ;;  %p278_p2 = scmp.eq.s32.totalorder %s5229_s21, 1 }
   0x7   : > { %p283_p3 = scmp.ne.s32.totalorder %s5132_s18, %s5128_s17  ;;  %p284_p4 = scmp.eq.s32.totalorder %s4716_s22, 1 }
   0x8   : > { %s5244_s26 = scalar_select %p265_p1, %s5136_s19, %s267_s24  }
   0x9   : > { %p5246_p5 = por %p278_p2, %p277_p0  ;;  %p5250_p6 = por %p284_p4, %p283_p3 }
   0xa   : > { %6678 = sst [smem:[#allocation5_spill]] %s5244_s26  ;;  %p4719_p7 = scmp.ge.s32.totalorder %s5140_s20, 1 }
   0xb   : > { %p342_p8 = scmp.lt.s32.totalorder %s5140_s20, 3 }
   0xd   : > { %p343_p9 = pnand %p4719_p7, %p342_p8 }
   0xf   : > { %346 = sbr.rel (%p343_p9) target bundleno = 1898 (0x76a), region = 64 }
  0x16   : > { %v1950_v0 = vld [vmem:[%s6639_s3] sm:$0xff]  ;;  %v1951_v1 = vld [vmem:[%s6639_s3 + $0x8] sm:$0xff]  ;;  %v6652_v3 = vlaneseq  ;;  %v6650_v4 = vmov 0.0|0.0   ;;  %v1952_v7 = vld [vmem:[%s6639_s3 + $0x10] sm:$0xff]  ;;  %s4721_s12 = sshll.u32 %s5229_s21, 3  ;;  %vm5143_vm0 = vmmov 0  }
  0x17   : > { %v406_v2 = vld [vmem:[%s6638_s2] sm:$0xff]  ;;  %4960 = vmatprep.subr.bf16.mxu1 %v6650_v4  ;;  %4954 = vmatprep.subr.bf16.mxu0 %v6650_v4  ;;  %v4961_v5 = vpack.c.bf16 %v1951_v1, %v1950_v0  ;;  %v407_v6 = vld [vmem:[%s6638_s2 + $0x8] sm:$0xff]  ;;  %v1953_v8 = vld [vmem:[%s6639_s3 + $0x18] sm:$0xff]  ;;  %v6648_v12 = vmov 0.0   ;;  %p384_p10 = scmp.lt.s32.totalorder %s4721_s12, 15  ;;  %vm1371_vm1 = vcmask 261120  }
  0x18   : > { %v4955_v9 = vpack.c.bf16 %v407_v6, %v406_v2  ;;  %v408_v10 = vld [vmem:[%s6638_s2 + $0x10] sm:$0xff]  ;;  %v409_v11 = vld [vmem:[%s6638_s2 + $0x18] sm:$0xff]  ;;  %4843 = vmatprep.mubr.msk.f32.mxu0 %vm5143_vm0, %v6648_v12  ;;  %4878 = vmatprep.mubr.msk.f32.mxu1 %vm5143_vm0, %v6648_v12  ;;  %v5145_v13 = vmov 1966171168   ;;  %v5288_v15 = vshrl.u32 %v6652_v3, 7  ;;  %v4964_v16 = vpack.c.bf16 %v1953_v8, %v1952_v7  ;;  %v5298_v20 = vld [vmem:[%s6637_s1] sm:$0xff] }
  0x19   : > { %v428_v14 = vunpack.c.l.s4 %v5145_v13  ;;  %4962 = vmatpush3.bf16.msra.mxu1 %v4961_v5  ;;  %v4958_v17 = vpack.c.bf16 %v409_v11, %v408_v10  ;;  %s6781_s12 = smov (!%p384_p10, %s4721_s12), 15  ;;  %v5303_v21 = vld [vmem:[%s6637_s1 + $0x8] sm:$0xff]  ;;  %vm2519_vm2 = vcmask 1041409   ;;  %vm2522_vm3 = vcmask 1042434   ;;  %s380_s14 = sand.u32 1, %s5132_s18  }
  0x1a   : > { %6681 = vst [vmem:[#allocation6_spill] sm:$0xff] %v5288_v15  ;;  %4956 = vmatpush3.bf16.msra.mxu0 %v4955_v9  ;;  %4963 = vmatprep.subr.bf16.mxu1 %v6650_v4  ;;  %s4786_s26 = sshll.u32 %s6781_s12, 4  ;;  %v4967_v27 = vpack.c.bf16 %v5303_v21, %v5298_v20  ;;  %vm2525_vm4 = vcmask 1043459   ;;  %vm2528_vm5 = vcmask 1044484   ;;  %vm2531_vm6 = vcmask 1045509   ;;  %s4720_s15 = sshll.u32 %s380_s14, 3 }
  0x1b   : > { %v429_v18 = vunpack.c.0.s8 %v428_v14  ;;  %4957 = vmatprep.subr.bf16.mxu0 %v6650_v4  ;;  %s5308_s13 = scalar_lea.vmem %s6636_s0, %s4786_s26  ;;  %vm2534_vm7 = vcmask 1046534   ;;  %vm2537_vm8 = vcmask 1047559   ;;  %vm3237_vm9 = vcmask 64512   ;;  %s4783_s22 = sshll.u32 %s5229_s21, 7 }
  0x1c   : > { %v5312_v22 = vld [vmem:[%s5308_s13] sm:$0xff]  ;;  %v4724_v23 = vld.sshfl [vmem:[%s5308_s13 + $0x8] sm:$0x1 pattern:$0x75316420]  ;;  %v5316_v24 = vld [vmem:[%s5308_s13 + $0x10] sm:$0xff] }
  0x1d   : > { %v5293_v19 = vsub.s32 %v429_v18, %v5288_v15  ;;  %4965 = vmatpush3.bf16.msra.mxu1 %v4964_v16  ;;  %v426_v25 = vcombine.high %v5312_v22, %v5312_v22  ;;  %v489_v28 = vcombine.high %v5316_v24, %v5316_v24  ;;  %v4725_v29 = vld.sshfl [vmem:[%s5308_s13 + $0x18] sm:$0x1 pattern:$0x75316420]  ;;  %v5328_v30 = vld [vmem:[%s5308_s13 + $0x20] sm:$0xff]  ;;  %v5362_v16 = vld [vmem:[%s6637_s1 + $0x10] sm:$0xff] }
  0x1e   : > { %4959 = vmatpush3.bf16.msra.mxu0 %v4958_v17  ;;  %4966 = vmatprep.subr.bf16.mxu1 %v6650_v4  ;;  %v552_v34 = vcombine.high %v5328_v30, %v5328_v30  ;;  %v4726_v14 = vld.sshfl [vmem:[%s5308_s13 + $0x28] sm:$0x1 pattern:$0x75316420]  ;;  %v5367_v17 = vld [vmem:[%s6637_s1 + $0x18] sm:$0xff]  ;;  %vm3241_vm10 = vcmask 57344  }
  0x1f   : > { %v433_v26 = vrot.slane %v5312_v22, %v5293_v19  ;;  %4972 = vmatprep.subr.bf16.mxu0 %v6650_v4  ;;  %v488_v31 = vrot.slane %v4724_v23, %v5293_v19  ;;  %v496_v32 = vrot.slane %v5316_v24, %v5293_v19  ;;  %v551_v33 = vrot.slane %v4725_v29, %v5293_v19  ;;  %s382_s24 = scalar_lea.vmem [#allocation2], %s4720_s15  ;;  %s4644_s12 = scalar_lea.sflag [#allocation3], %s380_s14 }
  0x20   : > { %v440_v35 = vrot.slane %v426_v25, %v5293_v19  ;;  %v503_v38 = vrot.slane %v489_v28, %v5293_v19  ;;  %v559_v41 = vrot.slane %v5328_v30, %v5293_v19  ;;  %v566_v42 = vrot.slane %v552_v34, %v5293_v19  ;;  %v5376_v34 = vld [vmem:[%s5308_s13 + $0x30] sm:$0xff]  ;;  %s4657_s25 = sshll.u32 %s382_s24, 4  ;;  %s5147_s21 = smov [#allocation2]   ;;  %s6596_s25 = int_to_ptr.vmem [resolvable:$true] %s4657_s25 }
  0x21   : > { %v441_v36 = vcombine.high %v433_v26, %v433_v26  ;;  %v449_v37 = vrot.slane %v433_v26, %v5293_v19  ;;  %v504_v39 = vcombine.high %v496_v32, %v496_v32  ;;  %v512_v40 = vrot.slane %v496_v32, %v5293_v19  ;;  %s5078_s26 = scalar_lea.vmem %s6596_s25, 128  ;;  %s5082_s15 = sshll.u32 %s5147_s21, 4  ;;  %s5083_s15 = int_to_ptr.vmem [resolvable:$false] %s5082_s15 }
  0x22   : > { %v442_v43 = vcombine.high %v440_v35, %v440_v35  ;;  %v456_v44 = vrot.slane %v440_v35, %v5293_v19  ;;  %v505_v46 = vcombine.high %v503_v38, %v503_v38  ;;  %v519_v47 = vrot.slane %v503_v38, %v5293_v19  ;;  %p5079_p11 = scmp.ne.s32.totalorder %s6596_s25, %s5078_s26  ;;  %s5084_s16 = scalar_lea.vmem %s5083_s15, 256 }
  0x23   : > { %v463_v45 = vrot.slane %v441_v36, %v5293_v19  ;;  %v526_v48 = vrot.slane %v504_v39, %v5293_v19  ;;  %v534_v49 = vcombine.high %v512_v40, %v512_v40  ;;  %v979_v50 = vcombine.low %v488_v31, %v512_v40  ;;  %p5085_p0 = scmp.lt.s32.totalorder %s6596_s25, %s5083_s15  ;;  %p5086_p1 = scmp.lt.s32.totalorder %s5084_s16, %s5078_s26 }
  0x24   : > { %v470_v51 = vrot.slane %v442_v43, %v5293_v19  ;;  %v533_v54 = vrot.slane %v505_v46, %v5293_v19  ;;  %v535_v55 = vcombine.high %v519_v47, %v519_v47  ;;  %v567_v8 = vcombine.high %v559_v41, %v559_v41  ;;  %p5080_p12 = pnand %p5079_p11, %p5246_p5 }
  0x25   : > { %v930_v52 = vcombine.low %v449_v37, %v463_v45  ;;  %v4732_v53 = vcombine.high %v449_v37, %v463_v45  ;;  %v536_v56 = vcombine.high %v526_v48, %v526_v48  ;;  %v980_v57 = vcombine.low %v526_v48, %v534_v49  ;;  %p5087_p2 = por %p5086_p1, %p5085_p0 }
  0x26   : > { %v989_v58 = vrot.slane %v979_v50, %v5293_v19  ;;  %v932_v59 = vcombine.low %v456_v44, %v470_v51  ;;  %v4733_v60 = vcombine.high %v456_v44, %v470_v51  ;;  %v982_v0 = vcombine.low %v533_v54, %v535_v55  ;;  %p5081_p13 = pneg %p5080_p12 }
  0x27   : > { %v940_v61 = vrot.slane %v930_v52, %v5293_v19  ;;  %v947_v62 = vrot.slane %v4732_v53, %v5293_v19  ;;  %v981_v63 = vcombine.low %v536_v56, %v519_v47  ;;  %v996_v1 = vrot.slane %v980_v57, %v5293_v19 }
  0x28   : > { %v537_v2 = vcombine.high %v533_v54, %v533_v54  ;;  %v954_v5 = vrot.slane %v932_v59, %v5293_v19  ;;  %v961_v6 = vrot.slane %v4733_v60, %v5293_v19  ;;  %v1010_v10 = vrot.slane %v982_v0, %v5293_v19  ;;  %p5088_p3 = pnand %p5087_p2, %p5081_p13 }
  0x29   : > { %v962_v7 = vcombine.low %v940_v61, %v947_v62  ;;  %v1003_v9 = vrot.slane %v981_v63, %v5293_v19  ;;  %v1011_v11 = vcombine.low %v989_v58, %v996_v1  ;;  %v568_v13 = vcombine.high %v566_v42, %v566_v42  ;;  %v5413_v1 = vld [vmem:[%s5308_s13 + $0x40] sm:$0xff] }
  0x2a   : > { %v963_v18 = vcombine.low %v954_v5, %v961_v6  ;;  %v575_v25 = vrot.slane %v559_v41, %v5293_v19  ;;  %v582_v26 = vrot.slane %v566_v42, %v5293_v19  ;;  %v589_v31 = vrot.slane %v567_v8, %v5293_v19 }
  0x2b   : > { %v970_v23 = vrot.slane %v962_v7, %v5293_v19  ;;  %v1012_v28 = vcombine.low %v1003_v9, %v1010_v10  ;;  %v1019_v29 = vrot.slane %v1011_v11, %v5293_v19  ;;  %v596_v32 = vrot.slane %v568_v13, %v5293_v19  ;;  %v4728_v7 = vld.sshfl [vmem:[%s5308_s13 + $0x48] sm:$0x1 pattern:$0x75316420] }
  0x2c   : > { %v977_v35 = vrot.slane %v963_v18, %v5293_v19  ;;  %v1028_v36 = vcombine.low %v537_v2, %v551_v33  ;;  %v614_v37 = vrot.slane %v4726_v14, %v5293_v19  ;;  %v4970_v38 = vpack.c.bf16 %v5367_v17, %v5362_v16  ;;  %v5426_v17 = vld [vmem:[%s5308_s13 + $0x50] sm:$0xff] }
  0x2d   : > { %v1026_v39 = vrot.slane %v1012_v28, %v5293_v19  ;;  %v1029_v40 = vcombine.low %v575_v25, %v589_v31  ;;  %v4734_v41 = vcombine.high %v575_v25, %v589_v31  ;;  %v1031_v42 = vcombine.low %v582_v26, %v596_v32  ;;  %v5437_v28 = vld.sshfl [vmem:[%s5308_s13 + $0x58] sm:$0x1 pattern:$0x75316420] }
  0x2e   : > { %v978_v43 = vcombine.low %v970_v23, %v977_v35  ;;  %v1038_v44 = vrot.slane %v1028_v36, %v5293_v19  ;;  %v615_v45 = vcombine.high %v5376_v34, %v5376_v34  ;;  %v622_v46 = vrot.slane %v5376_v34, %v5293_v19 }
  0x2f   : > { %v1027_v33 = vcombine.low %v1019_v29, %v1026_v39  ;;  %v1045_v47 = vrot.slane %v1029_v40, %v5293_v19  ;;  %v1052_v48 = vrot.slane %v4734_v41, %v5293_v19  ;;  %v1059_v49 = vrot.slane %v1031_v42, %v5293_v19 }
  0x30   : > { %4844 = vmatmul.mubr.msk.f32.vlgmr.msra.gmra.mrb[0].mxu0 %vm1371_vm1, %v978_v43  ;;  %4879 = vmatmul.mubr.msk.f32.vlgmr.msra.gmra.mrb[0].mxu1 %vm1371_vm1, %v978_v43  ;;  %v629_v50 = vrot.slane %v615_v45, %v5293_v19  ;;  %v630_v51 = vcombine.high %v622_v46, %v622_v46  ;;  %v638_v52 = vrot.slane %v622_v46, %v5293_v19  ;;  %vm3330_vm11 = vcmask 130112  }
  0x31   : > { %4968 = vmatpush3.bf16.msra.mxu1 %v4967_v27  ;;  %4846 = vmatprep.mubr.msk.f32.mxu0 %vm5143_vm0, %v6648_v12  ;;  %v1060_v53 = vcombine.low %v1038_v44, %v1045_v47  ;;  %v1061_v54 = vcombine.low %v1052_v48, %v1059_v49  ;;  %v4735_v55 = vcombine.high %v582_v26, %v596_v32  ;;  %v4727_v27 = vld.sshfl [vmem:[%s5308_s13 + $0x38] sm:$0x1 pattern:$0x75316420]  ;;  %vm3403_vm12 = vcmask 72704  }
  0x32   : > { %4881 = vmatprep.mubr.msk.f32.mxu1 %vm5143_vm0, %v6648_v12  ;;  %v645_v56 = vrot.slane %v629_v50, %v5293_v19  ;;  %v652_v57 = vrot.slane %v630_v51, %v5293_v19  ;;  %v660_v58 = vcombine.high %v638_v52, %v638_v52  ;;  %v1078_v59 = vcombine.low %v614_v37, %v638_v52 }
  0x33   : > { %v1068_v60 = vrot.slane %v1060_v53, %v5293_v19  ;;  %v1075_v20 = vrot.slane %v1061_v54, %v5293_v19  ;;  %v1087_v21 = vrot.slane %v4735_v55, %v5293_v19  ;;  %v631_v61 = vcombine.high %v629_v50, %v629_v50  ;;  %4969 = vmatprep.subr.bf16.mxu1 %v6650_v4 }
  0x34   : > { %4847 = vmatmul.mubr.msk.f32.gmra.mrb[2].mxu0 %vm1371_vm1, %v1027_v33  ;;  %4882 = vmatmul.mubr.msk.f32.gmra.mrb[2].mxu1 %vm1371_vm1, %v1027_v33  ;;  %v662_v62 = vcombine.high %v652_v57, %v652_v57  ;;  %v1079_v63 = vcombine.low %v652_v57, %v660_v58  ;;  %v1094_v0 = vrot.slane %v1078_v59, %v5293_v19 }
  0x35   : > { %4849 = vmatprep.mubr.msk.f32.mxu0 %vm5143_vm0, %v6648_v12  ;;  %4884 = vmatprep.mubr.msk.f32.mxu1 %vm5143_vm0, %v6648_v12  ;;  %v1076_v2 = vcombine.low %v1068_v60, %v1075_v20  ;;  %v659_v5 = vrot.slane %v631_v61, %v5293_v19  ;;  %v661_v6 = vcombine.high %v645_v56, %v645_v56 }
  0x36   : > { %v1080_v8 = vcombine.low %v662_v62, %v645_v56  ;;  %v1101_v9 = vrot.slane %v1079_v63, %v5293_v19  ;;  %v1109_v10 = vcombine.low %v1087_v21, %v1094_v0  ;;  %v677_v11 = vrot.slane %v4727_v27, %v5293_v19  ;;  %4971 = vmatpush3.bf16.msra.mxu1 %v4970_v38  ;;  %v5470_v27 = vld [vmem:[%s5308_s13 + $0x60] sm:$0xff] }
  0x37   : > { %v663_v13 = vcombine.high %v659_v5, %v659_v5  ;;  %v685_v14 = vrot.slane %v5413_v1, %v5293_v19  ;;  %v1126_v16 = vcombine.low %v659_v5, %v661_v6  ;;  %v678_v18 = vcombine.high %v5413_v1, %v5413_v1  ;;  %4916 = vmatprep.subr.mxu1 %v6648_v12 }
  0x38   : > { %4850 = vmatmul.mubr.msk.f32.gmra.mrb[4].mxu0 %vm1371_vm1, %v1076_v2  ;;  %4885 = vmatmul.mubr.msk.f32.gmra.mrb[4].mxu1 %vm1371_vm1, %v1076_v2  ;;  %v1108_v23 = vrot.slane %v1080_v8, %v5293_v19  ;;  %v1117_v25 = vrot.slane %v1109_v10, %v5293_v19  ;;  %v740_v26 = vrot.slane %v4728_v7, %v5293_v19 }
  0x39   : > { %4852 = vmatprep.mubr.msk.f32.mxu0 %vm5143_vm0, %v6648_v12  ;;  %4887 = vmatprep.mubr.msk.f32.mxu1 %vm5143_vm0, %v6648_v12  ;;  %v693_v29 = vcombine.high %v685_v14, %v685_v14  ;;  %v701_v31 = vrot.slane %v685_v14, %v5293_v19  ;;  %v1127_v32 = vcombine.low %v663_v13, %v677_v11 }
  0x3a   : > { %v1110_v35 = vcombine.low %v1101_v9, %v1108_v23  ;;  %v1136_v36 = vrot.slane %v1126_v16, %v5293_v19  ;;  %v692_v37 = vrot.slane %v678_v18, %v5293_v19  ;;  %v748_v38 = vrot.slane %v5426_v17, %v5293_v19 }
  0x3b   : > { %v715_v39 = vrot.slane %v693_v29, %v5293_v19  ;;  %v1143_v40 = vrot.slane %v1127_v32, %v5293_v19  ;;  %v741_v41 = vcombine.high %v5426_v17, %v5426_v17  ;;  %v803_v42 = vrot.slane %v5437_v28, %v5293_v19 }
  0x3c   : > { %v1124_v43 = vrot.slane %v1110_v35, %v5293_v19  ;;  %v694_v44 = vcombine.high %v692_v37, %v692_v37  ;;  %v708_v45 = vrot.slane %v692_v37, %v5293_v19  ;;  %v756_v46 = vcombine.high %v748_v38, %v748_v38 }
  0x3d   : > { %v1128_v33 = vcombine.low %v701_v31, %v715_v39  ;;  %v4736_v47 = vcombine.high %v701_v31, %v715_v39  ;;  %v1158_v48 = vcombine.low %v1136_v36, %v1143_v40  ;;  %v764_v49 = vrot.slane %v748_v38, %v5293_v19  ;;  %v4730_v31 = vld.sshfl [vmem:[%s5308_s13 + $0x68] sm:$0x1 pattern:$0x75316420]  ;;  %v5499_v40 = vld [vmem:[%s5308_s13 + $0x70] sm:$0xff] }
  0x3e   : > { %v1125_v50 = vcombine.low %v1117_v25, %v1124_v43  ;;  %v722_v51 = vrot.slane %v694_v44, %v5293_v19  ;;  %v778_v52 = vrot.slane %v756_v46, %v5293_v19  ;;  %v755_v53 = vrot.slane %v741_v41, %v5293_v19 }
  0x3f   : > { %v1150_v54 = vrot.slane %v1128_v33, %v5293_v19  ;;  %v1157_v55 = vrot.slane %v4736_v47, %v5293_v19  ;;  %v1166_v56 = vrot.slane %v1158_v48, %v5293_v19  ;;  %v786_v57 = vcombine.high %v764_v49, %v764_v49 }
  0x40   : > { %4853 = vmatmul.mubr.msk.f32.gmra.mrb[6].mxu0 %vm1371_vm1, %v1125_v50  ;;  %4888 = vmatmul.mubr.msk.f32.gmra.mrb[6].mxu1 %vm1371_vm1, %v1125_v50  ;;  %v1175_v58 = vcombine.low %v708_v45, %v722_v51  ;;  %v4737_v59 = vcombine.high %v708_v45, %v722_v51  ;;  %v1177_v60 = vcombine.low %v740_v26, %v764_v49  ;;  %v2518_v32 = vrot.slane %v5316_v24, 7 }
  0x41   : > { %4855 = vmatprep.mubr.msk.f32.mxu0 %vm5143_vm0, %v6648_v12  ;;  %4890 = vmatprep.mubr.msk.f32.mxu1 %vm5143_vm0, %v6648_v12  ;;  %v1159_v20 = vcombine.low %v1150_v54, %v1157_v55  ;;  %v1178_v21 = vcombine.low %v778_v52, %v786_v57  ;;  %v757_v61 = vcombine.high %v755_v53, %v755_v53  ;;  %v2521_v38 = vrot.slane %v5328_v30, 6 }
  0x42   : > { %v1185_v62 = vrot.slane %v1175_v58, %v5293_v19  ;;  %v1192_v63 = vrot.slane %v4737_v59, %v5293_v19  ;;  %v1199_v0 = vrot.slane %v1177_v60, %v5293_v19  ;;  %v771_v2 = vrot.slane %v755_v53, %v5293_v19  ;;  %v4731_v59 = vld.sshfl [vmem:[%s5308_s13 + $0x78] sm:$0x1 pattern:$0x75316420]  ;;  %s6594_s13 = scalar_lea.hbm %s6647_s11, %s4783_s22 }
  0x43   : > { %v1173_v5 = vrot.slane %v1159_v20, %v5293_v19  ;;  %v1206_v6 = vrot.slane %v1178_v21, %v5293_v19  ;;  %v785_v7 = vrot.slane %v757_v61, %v5293_v19  ;;  %v788_v8 = vcombine.high %v778_v52, %v778_v52 }
  0x44   : > { %v1207_v9 = vcombine.low %v1185_v62, %v1192_v63  ;;  %v787_v10 = vcombine.high %v771_v2, %v771_v2  ;;  %v811_v11 = vrot.slane %v5470_v27, %v5293_v19  ;;  %v804_v13 = vcombine.high %v5470_v27, %v5470_v27 }
  0x45   : > { %v1174_v14 = vcombine.low %v1166_v56, %v1173_v5  ;;  %v1208_v16 = vcombine.low %v1199_v0, %v1206_v6  ;;  %v789_v18 = vcombine.high %v785_v7, %v785_v7  ;;  %v1224_v23 = vcombine.low %v788_v8, %v771_v2 }
  0x46   : > { %v1215_v25 = vrot.slane %v1207_v9, %v5293_v19  ;;  %v819_v26 = vcombine.high %v811_v11, %v811_v11  ;;  %v827_v28 = vrot.slane %v811_v11, %v5293_v19  ;;  %v1225_v29 = vcombine.low %v785_v7, %v787_v10 }
  0x47   : > { %4856 = vmatmul.mubr.msk.f32.gmra.mrb[8].mxu0 %vm1371_vm1, %v1174_v14  ;;  %4891 = vmatmul.mubr.msk.f32.gmra.mrb[8].mxu1 %vm1371_vm1, %v1174_v14  ;;  %v1222_v35 = vrot.slane %v1208_v16, %v5293_v19  ;;  %v1226_v36 = vcombine.low %v789_v18, %v803_v42  ;;  %v1234_v37 = vrot.slane %v1224_v23, %v5293_v19  ;;  %v2524_v52 = vrot.slane %v5376_v34, 5 }
  0x48   : > { %4858 = vmatprep.mubr.msk.f32.mxu0 %vm5143_vm0, %v6648_v12  ;;  %4893 = vmatprep.mubr.msk.f32.mxu1 %vm5143_vm0, %v6648_v12  ;;  %v841_v24 = vrot.slane %v819_v26, %v5293_v19  ;;  %v1241_v39 = vrot.slane %v1225_v29, %v5293_v19  ;;  %v818_v41 = vrot.slane %v804_v13, %v5293_v19  ;;  %v2527_v56 = vrot.slane %v5413_v1, 4 }
  0x49   : > { %v1223_v42 = vcombine.low %v1215_v25, %v1222_v35  ;;  %v1248_v43 = vrot.slane %v1226_v36, %v5293_v19  ;;  %v866_v44 = vrot.slane %v4730_v31, %v5293_v19  ;;  %v874_v45 = vrot.slane %v5499_v40, %v5293_v19 }
  0x4a   : > { %v1227_v46 = vcombine.low %v827_v28, %v841_v24  ;;  %v1256_v33 = vcombine.low %v1234_v37, %v1241_v39  ;;  %v820_v47 = vcombine.high %v818_v41, %v818_v41  ;;  %v834_v48 = vrot.slane %v818_v41, %v5293_v19 }
  0x4b   : > { %4859 = vmatmul.mubr.msk.f32.gmra.mrb[10].mxu0 %vm1371_vm1, %v1223_v42  ;;  %4894 = vmatmul.mubr.msk.f32.gmra.mrb[10].mxu1 %vm1371_vm1, %v1223_v42  ;;  %v890_v49 = vrot.slane %v874_v45, %v5293_v19  ;;  %v4738_v50 = vcombine.high %v827_v28, %v841_v24  ;;  %v867_v51 = vcombine.high %v5499_v40, %v5499_v40  ;;  %v2530_v41 = vrot.slane %v5426_v17, 3 }
  0x4c   : > { %4861 = vmatprep.mubr.msk.f32.mxu0 %vm5143_vm0, %v6648_v12  ;;  %4896 = vmatprep.mubr.msk.f32.mxu1 %vm5143_vm0, %v6648_v12  ;;  %v1255_v53 = vrot.slane %v1227_v46, %v5293_v19  ;;  %v1264_v54 = vrot.slane %v1256_v33, %v5293_v19  ;;  %v848_v55 = vrot.slane %v820_v47, %v5293_v19  ;;  %v2533_v17 = vrot.slane %v5470_v27, 2 }
  0x4d   : > { %v1276_v57 = vcombine.low %v866_v44, %v890_v49  ;;  %v1283_v58 = vrot.slane %v4738_v50, %v5293_v19  ;;  %v881_v34 = vrot.slane %v867_v51, %v5293_v19  ;;  %v882_v60 = vcombine.high %v874_v45, %v874_v45 }
  0x4e   : > { %v1257_v20 = vcombine.low %v1248_v43, %v1255_v53  ;;  %v1274_v21 = vcombine.low %v834_v48, %v848_v55  ;;  %v4739_v61 = vcombine.high %v834_v48, %v848_v55  ;;  %v912_v62 = vcombine.high %v890_v49, %v890_v49 }
  0x4f   : > { %v1304_v63 = vrot.slane %v1276_v57, %v5293_v19  ;;  %v883_v0 = vcombine.high %v881_v34, %v881_v34  ;;  %v897_v2 = vrot.slane %v881_v34, %v5293_v19  ;;  %v904_v5 = vrot.slane %v882_v60, %v5293_v19 }
  0x50   : > { %v1271_v1 = vrot.slane %v1257_v20, %v5293_v19  ;;  %v1290_v6 = vrot.slane %v1274_v21, %v5293_v19  ;;  %v1297_v7 = vrot.slane %v4739_v61, %v5293_v19  ;;  %v929_v8 = vrot.slane %v4731_v59, %v5293_v19 }
  0x51   : > { %v911_v9 = vrot.slane %v883_v0, %v5293_v19  ;;  %v913_v10 = vcombine.high %v897_v2, %v897_v2  ;;  %v914_v11 = vcombine.high %v904_v5, %v904_v5  ;;  %v1322_v13 = vcombine.low %v904_v5, %v912_v62 }
  0x52   : > { %v1272_v14 = vcombine.low %v1264_v54, %v1271_v1  ;;  %v1305_v16 = vcombine.low %v1283_v58, %v1290_v6  ;;  %v1306_v18 = vcombine.low %v1297_v7, %v1304_v63  ;;  %v2520_v23 = vsel %vm2519_vm2, %v2518_v32, %v5312_v22 }
  0x53   : > { %v915_v25 = vcombine.high %v911_v9, %v911_v9  ;;  %v1323_v26 = vcombine.low %v914_v11, %v897_v2  ;;  %v1324_v28 = vcombine.low %v911_v9, %v913_v10  ;;  %v1332_v29 = vrot.slane %v1322_v13, %v5293_v19 }
  0x54   : > { %4862 = vmatmul.mubr.msk.f32.gmra.mrb[12].mxu0 %vm1371_vm1, %v1272_v14  ;;  %4897 = vmatmul.mubr.msk.f32.gmra.mrb[12].mxu1 %vm1371_vm1, %v1272_v14  ;;  %v1313_v31 = vrot.slane %v1305_v16, %v5293_v19  ;;  %v1320_v35 = vrot.slane %v1306_v18, %v5293_v19  ;;  %v2523_v36 = vsel %vm2522_vm3, %v2521_v38, %v2520_v23  ;;  %v2536_v33 = vrot.slane %v5499_v40, 1 }
  0x55   : > { %4864 = vmatprep.mubr.msk.f32.mxu0 %vm5143_vm0, %v6648_v12  ;;  %4899 = vmatprep.mubr.msk.f32.mxu1 %vm5143_vm0, %v6648_v12  ;;  %v1325_v22 = vcombine.low %v915_v25, %v929_v8  ;;  %v1339_v32 = vrot.slane %v1323_v26, %v5293_v19  ;;  %v1346_v37 = vrot.slane %v1324_v28, %v5293_v19 }
  0x56   : > { %v1321_v24 = vcombine.low %v1313_v31, %v1320_v35  ;;  %v2526_v39 = vsel %vm2525_vm4, %v2524_v52, %v2523_v36 }
  0x57   : > { %v1353_v30 = vrot.slane %v1325_v22, %v5293_v19  ;;  %v1354_v38 = vcombine.low %v1332_v29, %v1339_v32  ;;  %v2529_v42 = vsel %vm2528_vm5, %v2527_v56, %v2526_v39 }
  0x58   : > { %4865 = vmatmul.mubr.msk.f32.gmra.mrb[14].mxu0 %vm1371_vm1, %v1321_v24  ;;  %4900 = vmatmul.mubr.msk.f32.gmra.mrb[14].mxu1 %vm1371_vm1, %v1321_v24  ;;  %v2532_v45 = vsel %vm2531_vm6, %v2530_v41, %v2529_v42 }
  0x59   : > { %4867 = vmatprep.mubr.msk.f32.mxu0 %vm5143_vm0, %v6648_v12  ;;  %4902 = vmatprep.mubr.msk.f32.mxu1 %vm5143_vm0, %v6648_v12  ;;  %v1355_v43 = vcombine.low %v1346_v37, %v1353_v30  ;;  %v1362_v44 = vrot.slane %v1354_v38, %v5293_v19  ;;  %v2535_v48 = vsel %vm2534_vm7, %v2533_v17, %v2532_v45 }
  0x5a   : > { %v5569_v27 = vsel %vm2537_vm8, %v2536_v33, %v2535_v48  ;;  %v5620_v48 = vsub.s32 0, %v5288_v15 }
  0x5b   : > { %v1369_v46 = vrot.slane %v1355_v43, %v5293_v19  ;;  %6682 = vst [vmem:[#allocation7_spill] sm:$0xff] %v5569_v27 }
  0x5d   : > { %v1370_v47 = vcombine.low %v1362_v44, %v1369_v46 }
  0x5f   : > { %4868 = vmatmul.mubr.msk.f32.gmra.mrb[16].mxu0 %vm1371_vm1, %v1370_v47  ;;  %4903 = vmatmul.mubr.msk.f32.gmra.mrb[16].mxu1 %vm1371_vm1, %v1370_v47 }
  0x60   : > { %4913 = vmatprep.mubr.msk.f32.mxu1 %vm5143_vm0, %v6648_v12  ;;  %4929 = vmatprep.mubr.msk.f32.mxu0 %vm5143_vm0, %v6648_v12 }
  0x63   : > { %4914 = vmatmul.mubr.msk.f32.vlgmr.msra.gmra.mrb[18].mxu1 %vm1371_vm1, %v5569_v27 }
  0x64   : > { %4918 = vmatprep.mubr.msk.f32.mxu1 %vm5143_vm0, %v6648_v12 }
 0x103   : > { %v5577_v40 = vpop.f32.mrb[0].mxu1  ;;  %v1456_v49 = vpop.f32.mrb[0].mxu0 }
 0x104   : > { %6683 = vst [vmem:[#allocation8_spill] sm:$0xff] %v5577_v40  ;;  %v4880_v50 = vpop.f32.mrb[1].mxu1  ;;  %v4845_v51 = vpop.f32.mrb[1].mxu0  ;;  %v1509_v53 = vcombine.high %v1456_v49, %v1456_v49  ;;  %v1516_v57 = vrot.slane %v1456_v49, %v5293_v19 }
 0x106   : > { %v1523_v20 = vrot.slane %v1509_v53, %v5293_v19  ;;  %v1524_v63 = vcombine.high %v1516_v57, %v1516_v57  ;;  %v1532_v11 = vrot.slane %v1516_v57, %v5293_v19 }
 0x107   : > { %v2025_v52 = vpop.f32.mrb[2].mxu1  ;;  %v1461_v54 = vpop.f32.mrb[2].mxu0 }
 0x108   : > { %v2122_v55 = vcombine.high %v2025_v52, %v2025_v52  ;;  %v4883_v56 = vpop.f32.mrb[3].mxu1  ;;  %v4848_v58 = vpop.f32.mrb[3].mxu0  ;;  %v2129_v59 = vrot.slane %v2025_v52, %v5293_v19  ;;  %v1525_v8 = vcombine.high %v1523_v20, %v1523_v20  ;;  %v1546_v13 = vrot.slane %v1524_v63, %v5293_v19 }
 0x109   : > { %v5597_v25 = vrot.slane %v1523_v20, %v5293_v19  ;;  %v1558_v35 = vcombine.high %v1461_v54, %v1461_v54  ;;  %v1565_v45 = vrot.slane %v1461_v54, %v5293_v19 }
 0x10a   : > { %v2136_v34 = vrot.slane %v2122_v55, %v5293_v19  ;;  %v2137_v61 = vcombine.high %v2129_v59, %v2129_v59  ;;  %v5587_v6 = vrot.slane %v2129_v59, %v5293_v19  ;;  %v5604_v31 = vrot.slane %v1525_v8, %v5293_v19 }
 0x10b   : > { %v2030_v60 = vpop.f32.mrb[4].mxu1  ;;  %v5583_v21 = vpop.f32.mrb[4].mxu0  ;;  %v2701_v38 = vcombine.low %v1532_v11, %v1546_v13  ;;  %v1572_v42 = vrot.slane %v1558_v35, %v5293_v19  ;;  %v4759_v17 = vcombine.high %v1532_v11, %v1546_v13 }
 0x10c   : > { %v4886_v62 = vpop.f32.mrb[5].mxu1  ;;  %v4851_v0 = vpop.f32.mrb[5].mxu0  ;;  %v2138_v2 = vcombine.high %v2136_v34, %v2136_v34  ;;  %v2171_v5 = vcombine.high %v2030_v60, %v2030_v60  ;;  %v2178_v1 = vrot.slane %v2030_v60, %v5293_v19  ;;  %6684 = vst [vmem:[#allocation9_spill] sm:$0xff] %v5587_v6  ;;  %v2159_v9 = vrot.slane %v2137_v61, %v5293_v19 }
 0x10d   : > { %v2152_v14 = vrot.slane %v2136_v34, %v5293_v19  ;;  %v2167_v26 = vcombine.high %v5587_v6, %v5587_v6  ;;  %v1574_v47 = vcombine.high %v1572_v42, %v1572_v42  ;;  %v5636_v56 = vrot.slane %v2701_v38, %v5293_v19 }
 0x10e   : > { %v2166_v7 = vrot.slane %v2138_v2, %v5293_v19  ;;  %v2185_v10 = vrot.slane %v2171_v5, %v5293_v19  ;;  %v2186_v18 = vcombine.high %v2178_v1, %v2178_v1  ;;  %v2194_v23 = vrot.slane %v2178_v1, %v5293_v19 }
 0x10f   : > { %v2169_v22 = vcombine.high %v2159_v9, %v2159_v9  ;;  %v2168_v41 = vcombine.high %v2152_v14, %v2152_v14  ;;  %v5615_v46 = vcombine.low %v2159_v9, %v2167_v26  ;;  %v5640_v59 = vrot.slane %v4759_v17, %v5293_v19 }
 0x110   : > { %v2170_v16 = vcombine.high %v2166_v7, %v2166_v7  ;;  %v2187_v32 = vcombine.high %v2185_v10, %v2185_v10  ;;  %v5609_v30 = vrot.slane %v2186_v18, %v5293_v19  ;;  %v5632_v54 = vrot.slane %v2185_v10, %v5293_v19 }
 0x111   : > { %6687 = vst [vmem:[#allocation12_spill] sm:$0xff] %v5615_v46  ;;  %v5622_v49 = vcombine.low %v2169_v22, %v2152_v14  ;;  %v5629_v53 = vcombine.low %v2166_v7, %v2168_v41  ;;  %v1573_v34 = vcombine.high %v1565_v45, %v1565_v45  ;;  %v5647_v62 = vrot.slane %v1565_v45, %v5293_v19 }
 0x112   : > { %v5601_v28 = vcombine.low %v2170_v16, %v2194_v23  ;;  %6686 = vst [vmem:[#allocation11_spill] sm:$0xff] %v5609_v30  ;;  %v5625_v50 = vrot.slane %v2187_v32, %v5293_v19  ;;  %6691 = vst [vmem:[#allocation16_spill] sm:$0xff] %v5632_v54  ;;  %v4769_v55 = vcombine.high %v2194_v23, %v5609_v30 }
 0x113   : > { %v2035_v29 = vpop.f32.mrb[6].mxu1  ;;  %v5606_v36 = vpop.f32.mrb[6].mxu0  ;;  %6688 = vst [vmem:[#allocation13_spill] sm:$0xff] %v5622_v49  ;;  %6690 = vst [vmem:[#allocation15_spill] sm:$0xff] %v5629_v53  ;;  %v1602_v63 = vrot.slane %v1574_v47, %v5293_v19  ;;  %v1607_v2 = vcombine.high %v5583_v21, %v5583_v21  ;;  %v1588_v8 = vrot.slane %v1572_v42, %v5293_v19 }
 0x114   : > { %6685 = vst [vmem:[#allocation10_spill] sm:$0xff] %v5601_v28  ;;  %v2220_v37 = vcombine.high %v2035_v29, %v2035_v29  ;;  %v4889_v24 = vpop.f32.mrb[7].mxu1  ;;  %v4854_v39 = vpop.f32.mrb[7].mxu0  ;;  %v2227_v43 = vrot.slane %v2035_v29, %v5293_v19  ;;  %6689 = vst [vmem:[#allocation14_spill] sm:$0xff] %v5625_v50  ;;  %v5658_v10 = vrot.slane %v4769_v55, %v5293_v19 }
 0x115   : > { %v1595_v18 = vrot.slane %v1573_v34, %v5293_v19  ;;  %v1614_v26 = vrot.slane %v5583_v21, %v5293_v19  ;;  %v1606_v32 = vcombine.high %v1602_v63, %v1602_v63  ;;  %v1656_v24 = vcombine.high %v5606_v36, %v5606_v36 }
 0x116   : > { %v2234_v44 = vrot.slane %v2220_v37, %v5293_v19  ;;  %v2235_v57 = vcombine.high %v2227_v43, %v2227_v43  ;;  %6692 = vst [vmem:[#allocation17_spill] sm:$0xff] %v5658_v10  ;;  %v1621_v37 = vrot.slane %v1607_v2, %v5293_v19  ;;  %v5674_v38 = vrot.slane %v2227_v43, %v5293_v19 }
 0x117   : > { %v1603_v42 = vcombine.high %v5647_v62, %v5647_v62  ;;  %v1604_v21 = vcombine.high %v1588_v8, %v1588_v8  ;;  %v1622_v45 = vcombine.high %v1614_v26, %v1614_v26  ;;  %v1630_v47 = vrot.slane %v1614_v26, %v5293_v19 }
 0x118   : > { %v2236_v51 = vcombine.high %v2234_v44, %v2234_v44  ;;  %v2250_v11 = vrot.slane %v2234_v44, %v5293_v19  ;;  %v2257_v16 = vrot.slane %v2235_v57, %v5293_v19  ;;  %6693 = vst [vmem:[#allocation18_spill] sm:$0xff] %v5674_v38  ;;  %v1605_v57 = vcombine.high %v1595_v18, %v1595_v18 }
 0x119   : > { %v5686_v2 = vcombine.low %v1606_v32, %v1630_v47  ;;  %v5695_v26 = vrot.slane %v1622_v45, %v5293_v19  ;;  %v5701_v32 = vcombine.low %v1602_v63, %v1604_v21 }
 0x11a   : > { %v2264_v58 = vrot.slane %v2236_v51, %v5293_v19  ;;  %v2040_v60 = vpop.f32.mrb[8].mxu1  ;;  %v5642_v20 = vpop.f32.mrb[8].mxu0  ;;  %v1663_v51 = vrot.slane %v5606_v36, %v5293_v19  ;;  %v2266_v55 = vcombine.high %v2250_v11, %v2250_v11  ;;  %v5699_v3 = vcombine.low %v1605_v57, %v1588_v8 }
 0x11b   : > { %v4892_v0 = vpop.f32.mrb[9].mxu1  ;;  %v4857_v5 = vpop.f32.mrb[9].mxu0  ;;  %v2269_v9 = vcombine.high %v2040_v60, %v2040_v60  ;;  %v2276_v14 = vrot.slane %v2040_v60, %v5293_v19  ;;  %v3788_v60 = vcombine.low %v5674_v38, %v2257_v16  ;;  %v4761_v57 = vcombine.high %v1630_v47, %v5695_v26 }
 0x11c   : > { %v2268_v13 = vcombine.high %v2264_v58, %v2264_v58  ;;  %v1623_v0 = vcombine.high %v1621_v37, %v1621_v37  ;;  %v1670_v5 = vrot.slane %v1656_v24, %v5293_v19  ;;  %v5697_v4 = vcombine.low %v2264_v58, %v2266_v55 }
 0x11d   : > { %v2283_v23 = vrot.slane %v2269_v9, %v5293_v19  ;;  %v2292_v22 = vrot.slane %v2276_v14, %v5293_v19  ;;  %v2284_v44 = vcombine.high %v2276_v14, %v2276_v14  ;;  %v2267_v9 = vcombine.high %v2257_v16, %v2257_v16 }
 0x11e   : > { %v2045_v29 = vpop.f32.mrb[10].mxu1  ;;  %v5667_v35 = vpop.f32.mrb[10].mxu0  ;;  %6696 = vst [vmem:[#allocation21_spill] sm:$0xff] %v5697_v4  ;;  %v1651_v24 = vrot.slane %v1623_v0, %v5293_v19  ;;  %v5735_v0 = vrot.slane %v1663_v51, %v5293_v19  ;;  %v5751_v61 = vrot.slane %v4761_v57, %v5293_v19 }
 0x11f   : > { %v4895_v39 = vpop.f32.mrb[11].mxu1  ;;  %v4860_v41 = vpop.f32.mrb[11].mxu0  ;;  %v5678_v17 = vcombine.low %v2268_v13, %v2292_v22  ;;  %v2285_v43 = vcombine.high %v2283_v23, %v2283_v23  ;;  %v5689_v13 = vcombine.low %v1595_v18, %v1603_v42  ;;  %v5692_v14 = vrot.slane %v2284_v44, %v5293_v19 }
 0x120   : > { %v2314_v36 = vcombine.high %v2292_v22, %v2292_v22  ;;  %v1671_v39 = vcombine.high %v1663_v51, %v1663_v51  ;;  %v1672_v41 = vcombine.high %v1670_v5, %v1670_v5  ;;  %v2318_v12 = vcombine.high %v2045_v29, %v2045_v29 }
 0x121   : > { %6694 = vst [vmem:[#allocation19_spill] sm:$0xff] %v5678_v17  ;;  %6695 = vst [vmem:[#allocation20_spill] sm:$0xff] %v5692_v14  ;;  %v5704_v16 = vrot.slane %v2285_v43, %v5293_v19  ;;  %v5707_v18 = vrot.slane %v3788_v60, %v5293_v19  ;;  %v1637_v22 = vrot.slane %v1621_v37, %v5293_v19 }
 0x122   : > { %v2325_v42 = vrot.slane %v2045_v29, %v5293_v19  ;;  %v5716_v8 = vcombine.low %v2267_v9, %v2250_v11  ;;  %v5719_v63 = vrot.slane %v2283_v23, %v5293_v19  ;;  %v5722_v21 = vcombine.low %v5692_v14, %v2314_v36 }
 0x123   : > { %6697 = vst [vmem:[#allocation22_spill] sm:$0xff] %v5704_v16  ;;  %6698 = vst [vmem:[#allocation23_spill] sm:$0xff] %v5707_v18  ;;  %v1700_v45 = vrot.slane %v1672_v41, %v5293_v19  ;;  %v1693_v29 = vrot.slane %v1671_v39, %v5293_v19  ;;  %v2332_v43 = vrot.slane %v2318_v12, %v5293_v19 }
 0x124   : > { %6699 = vst [vmem:[#allocation24_spill] sm:$0xff] %v5716_v8  ;;  %6700 = vst [vmem:[#allocation25_spill] sm:$0xff] %v5719_v63  ;;  %v1705_v11 = vcombine.high %v5642_v20, %v5642_v20  ;;  %v1686_v9 = vrot.slane %v1670_v5, %v5293_v19  ;;  %v2828_v36 = vcombine.low %v1637_v22, %v1651_v24 }
 0x125   : > { %6701 = vst [vmem:[#allocation26_spill] sm:$0xff] %v5722_v21  ;;  %v1703_v47 = vcombine.high %v1693_v29, %v1693_v29  ;;  %v2333_v41 = vcombine.high %v2325_v42, %v2325_v42  ;;  %v1712_v12 = vrot.slane %v5642_v20, %v5293_v19  ;;  %v4762_v23 = vcombine.high %v1637_v22, %v1651_v24 }
 0x126   : > { %v1704_v60 = vcombine.high %v1700_v45, %v1700_v45  ;;  %v1754_v51 = vcombine.high %v5667_v35, %v5667_v35  ;;  %v2334_v20 = vcombine.high %v2332_v43, %v2332_v43  ;;  %v1719_v34 = vrot.slane %v1705_v11, %v5293_v19 }
 0x127   : > { %v5712_v44 = vpop.f32.mrb[12].mxu1  ;;  %v5714_v58 = vpop.f32.mrb[12].mxu0  ;;  %v1702_v52 = vcombine.high %v1686_v9, %v1686_v9  ;;  %v2830_v33 = vcombine.low %v5735_v0, %v1693_v29  ;;  %v5756_v22 = vrot.slane %v2332_v43, %v5293_v19  ;;  %v1728_v24 = vrot.slane %v1712_v12, %v5293_v19 }
 0x128   : > { %v4898_v55 = vpop.f32.mrb[13].mxu1  ;;  %v4863_v37 = vpop.f32.mrb[13].mxu0  ;;  %v1761_v57 = vrot.slane %v5667_v35, %v5293_v19  ;;  %v5770_v11 = vrot.slane %v4762_v23, %v5293_v19  ;;  %v1720_v29 = vcombine.high %v1712_v12, %v1712_v12  ;;  %v1768_v43 = vrot.slane %v1754_v51, %v5293_v19 }
 0x129   : > { %6702 = vst [vmem:[#allocation27_spill] sm:$0xff] %v5756_v22  ;;  %v5765_v37 = vrot.slane %v2333_v41, %v5293_v19  ;;  %v5772_v1 = vcombine.low %v1704_v60, %v1728_v24  ;;  %v1721_v41 = vcombine.high %v1719_v34, %v1719_v34  ;;  %v5782_v27 = vrot.slane %v2830_v33, %v5293_v19 }
 0x12a   : > { %v5784_v35 = vcombine.low %v1700_v45, %v1702_v52  ;;  %v2364_v23 = vcombine.high %v5756_v22, %v5756_v22  ;;  %v1769_v60 = vcombine.high %v1761_v57, %v1761_v57  ;;  %v2367_v33 = vcombine.high %v5712_v44, %v5712_v44 }
 0x12b   : > { %v5740_v39 = vpop.f32.mrb[14].mxu0  ;;  %v5742_v55 = vpop.f32.mrb[14].mxu1  ;;  %6703 = vst [vmem:[#allocation28_spill] sm:$0xff] %v5765_v37  ;;  %v5801_v14 = vrot.slane %v1720_v29, %v5293_v19  ;;  %v1750_v38 = vcombine.high %v1728_v24, %v1728_v24  ;;  %v2374_v30 = vrot.slane %v5712_v44, %v5293_v19  ;;  %v1749_v6 = vrot.slane %v1721_v41, %v5293_v19 }
 0x12c   : > { %v4901_v7 = vpop.f32.mrb[15].mxu1  ;;  %v4866_v5 = vpop.f32.mrb[15].mxu0  ;;  %v1803_v29 = vcombine.high %v5714_v58, %v5714_v58  ;;  %v5827_v16 = vrot.slane %v1768_v43, %v5293_v19 }
 0x12d   : > { %v5760_v7 = vrot.slane %v2828_v36, %v5293_v19  ;;  %v5762_v5 = vcombine.low %v1703_v47, %v1686_v9  ;;  %v5778_v9 = vrot.slane %v2325_v42, %v5293_v19  ;;  %v2362_v47 = vrot.slane %v2334_v20, %v5293_v19 }
 0x12e   : > { %v1770_v36 = vcombine.high %v1768_v43, %v1768_v43  ;;  %v1735_v42 = vrot.slane %v1719_v34, %v5293_v19  ;;  %v2382_v17 = vcombine.high %v2374_v30, %v2374_v30  ;;  %v2381_v34 = vrot.slane %v2367_v33, %v5293_v19 }
 0x12f   : > { %6704 = vst [vmem:[#allocation29_spill] sm:$0xff] %v5778_v9  ;;  %v3913_v20 = vcombine.low %v5778_v9, %v5765_v37  ;;  %v2366_v15 = vcombine.high %v2362_v47, %v2362_v47  ;;  %v5817_v44 = vcombine.low %v2362_v47, %v2364_v23  ;;  %v1810_v47 = vrot.slane %v5714_v58, %v5293_v19 }
 0x130   : > { %v1798_v40 = vrot.slane %v1770_v36, %v5293_v19  ;;  %v2390_v36 = vrot.slane %v2374_v30, %v5293_v19  ;;  %v1817_v23 = vrot.slane %v1803_v29, %v5293_v19  ;;  %v1852_v30 = vcombine.high %v5740_v39, %v5740_v39 }
 0x131   : > { %v5815_v24 = vrot.slane %v3913_v20, %v5293_v19  ;;  %6706 = vst [vmem:[#allocation31_spill] sm:$0xff] %v5817_v44  ;;  %v2953_v20 = vcombine.low %v1735_v42, %v1749_v6  ;;  %v4763_v33 = vcombine.high %v1735_v42, %v1749_v6  ;;  %v1818_v43 = vcombine.high %v1810_v47, %v1810_v47 }
 0x132   : > { %v5788_v12 = vpop.f32.mrb[16].mxu0  ;;  %v5790_v51 = vpop.f32.mrb[16].mxu1  ;;  %v1802_v63 = vcombine.high %v1798_v40, %v1798_v40  ;;  %v5829_v21 = vcombine.low %v2366_v15, %v2390_v36  ;;  %v1826_v4 = vrot.slane %v1810_v47, %v5293_v19  ;;  %v1859_v29 = vrot.slane %v5740_v39, %v5293_v19 }
 0x133   : > { %v4904_v52 = vpop.f32.mrb[17].mxu1  ;;  %v4869_v45 = vpop.f32.mrb[17].mxu0  ;;  %6705 = vst [vmem:[#allocation30_spill] sm:$0xff] %v5815_v24  ;;  %v2383_v24 = vcombine.high %v2381_v34, %v2381_v34  ;;  %v1866_v8 = vrot.slane %v1852_v30, %v5293_v19  ;;  %v1800_v6 = vcombine.high %v5827_v16, %v5827_v16  ;;  %v1819_v42 = vcombine.high %v1817_v23, %v1817_v23 }
 0x134   : > { %v1777_v52 = vrot.slane %v1761_v57, %v5293_v19  ;;  %v1791_v45 = vrot.slane %v1769_v60, %v5293_v19  ;;  %v5824_v60 = vcombine.low %v5801_v14, %v1750_v38  ;;  %6707 = vst [vmem:[#allocation32_spill] sm:$0xff] %v5829_v21  ;;  %v2404_v38 = vrot.slane %v2382_v17, %v5293_v19 }
 0x135   : > { %v2412_v17 = vcombine.high %v2390_v36, %v2390_v36  ;;  %v5853_v47 = vrot.slane %v4763_v33, %v5293_v19  ;;  %v5862_v30 = vrot.slane %v2383_v24, %v5293_v19  ;;  %v1840_v36 = vrot.slane %v1818_v43, %v5293_v19 }
 0x136   : > { %v5812_v22 = vpop.f32.mrb[18].mxu1  ;;  %v4764_v57 = vcombine.high %v1777_v52, %v1791_v45  ;;  %v2414_v58 = vcombine.high %v2404_v38, %v2404_v38  ;;  %v5866_v18 = vrot.slane %v2381_v34, %v5293_v19  ;;  %v1868_v10 = vcombine.high %v1866_v8, %v1866_v8 }
 0x137   : > { %v4915_v41 = vpop.f32.mrb[19].mxu1  ;;  %6708 = vst [vmem:[#allocation33_spill] sm:$0xff] %v5862_v30  ;;  %v2416_v33 = vcombine.high %v5742_v55, %v5742_v55  ;;  %v5872_v37 = vcombine.low %v2404_v38, %v2412_v17  ;;  %v5876_v24 = vrot.slane %v1819_v42, %v5293_v19  ;;  %v2423_v34 = vrot.slane %v5742_v55, %v5293_v19 }
 0x138   : > { %v2955_v41 = vcombine.low %v1777_v52, %v1791_v45  ;;  %v5847_v52 = vcombine.low %v1802_v63, %v1826_v4  ;;  %v5850_v45 = vrot.slane %v2953_v20, %v5293_v19  ;;  %v5859_v39 = vrot.slane %v4764_v57, %v5293_v19  ;;  %6709 = vst [vmem:[#allocation34_spill] sm:$0xff] %v5866_v18 }
 0x139   : > { %v1848_v63 = vcombine.high %v1826_v4, %v1826_v4  ;;  %v1867_v20 = vcombine.high %v1859_v29, %v1859_v29  ;;  %6710 = vst [vmem:[#allocation35_spill] sm:$0xff] %v5872_v37  ;;  %v1833_v57 = vrot.slane %v1817_v23, %v5293_v19  ;;  %v5879_v43 = vcombine.low %v2414_v58, %v5866_v18 }
 0x13a   : > { %v5856_v15 = vrot.slane %v2955_v41, %v5293_v19  ;;  %v5870_v41 = vcombine.low %v1798_v40, %v1800_v6  ;;  %v2430_v9 = vrot.slane %v2416_v33, %v5293_v19  ;;  %v1850_v38 = vcombine.high %v1840_v36, %v1840_v36 }
 0x13b   : > { %6711 = vst [vmem:[#allocation36_spill] sm:$0xff] %v5879_v43  ;;  %v5888_v6 = vcombine.low %v1840_v36, %v1848_v63  ;;  %v1875_v23 = vrot.slane %v1859_v29, %v5293_v19  ;;  %v5892_v17 = vrot.slane %v1866_v8, %v5293_v19  ;;  %v1889_v58 = vrot.slane %v1867_v20, %v5293_v19 }
 0x13c   : > { %v1896_v42 = vrot.slane %v1868_v10, %v5293_v19  ;;  %v2432_v4 = vcombine.high %v2430_v9, %v2430_v9  ;;  %v4765_v33 = vcombine.high %v1833_v57, %v5876_v24  ;;  %v1901_v40 = vcombine.high %v5788_v12, %v5788_v12 }
 0x13d   : > { %v1908_v36 = vrot.slane %v5788_v12, %v5293_v19  ;;  %v2431_v29 = vcombine.high %v2423_v34, %v2423_v34  ;;  %v5908_v20 = vcombine.low %v1850_v38, %v1833_v57  ;;  %v3080_v30 = vcombine.low %v1875_v23, %v1889_v58 }
 0x13e   : > { %v5906_v63 = vrot.slane %v2432_v4, %v5293_v19  ;;  %v1900_v10 = vcombine.high %v1896_v42, %v1896_v42  ;;  %v1915_v50 = vrot.slane %v1901_v40, %v5293_v19  ;;  %v2465_v12 = vcombine.high %v5790_v51, %v5790_v51 }
 0x13f   : > { %v1916_v54 = vcombine.high %v1908_v36, %v1908_v36  ;;  %v1924_v18 = vrot.slane %v1908_v36, %v5293_v19  ;;  %v5918_v8 = vrot.slane %v5790_v51, %v5293_v19  ;;  %v4766_v4 = vcombine.high %v1875_v23, %v1889_v58 }
 0x140   : > { %v3082_v57 = vcombine.low %v5892_v17, %v1896_v42  ;;  %v1917_v38 = vcombine.high %v1915_v50, %v1915_v50  ;;  %v1931_v28 = vrot.slane %v1915_v50, %v5293_v19  ;;  %v5923_v55 = vrot.slane %v2431_v29, %v5293_v19 }
 0x141   : > { %v1938_v40 = vrot.slane %v1916_v54, %v5293_v19  ;;  %v5926_v53 = vcombine.low %v1900_v10, %v1924_v18  ;;  %v2464_v36 = vcombine.high %v5906_v63, %v5906_v63  ;;  %v5933_v23 = vrot.slane %v4765_v33, %v5293_v19 }
 0x142   : > { %v5936_v58 = vrot.slane %v2423_v34, %v5293_v19  ;;  %v2612_v50 = vcombine.high %v5812_v22, %v5812_v22  ;;  %v5941_v42 = vrot.slane %v3080_v30, %v5293_v19  ;;  %v1946_v54 = vcombine.high %v1924_v18, %v1924_v18 }
 0x143   : > { %v5944_v29 = vrot.slane %v2465_v12, %v5293_v19  ;;  %v5948_v10 = vrot.slane %v5918_v8, %v5293_v19  ;;  %v5951_v33 = vrot.slane %v4766_v4, %v5293_v19  ;;  %v5954_v34 = vrot.slane %v1917_v38, %v5293_v19 }
 0x144   : > { %v1947_v51 = vcombine.high %v1931_v28, %v1931_v28  ;;  %v1948_v49 = vcombine.high %v1938_v40, %v1938_v40  ;;  %v5957_v46 = vrot.slane %v3082_v57, %v5293_v19  ;;  %v5960_v18 = vrot.slane %v2430_v9, %v5293_v19 }
 0x145   : > { %v5965_v12 = vcombine.low %v2464_v36, %v5948_v10  ;;  %v2619_v21 = vrot.slane %v5812_v22, %v5293_v19  ;;  %v5974_v57 = vrot.slane %v2612_v50, %v5293_v19  ;;  %v5976_v9 = vcombine.low %v1938_v40, %v1946_v54 }
 0x146   : > { %v6713_v4 = vcombine.low %v5597_v25, %v5604_v31  ;;  %v5986_v38 = vcombine.low %v1948_v49, %v1931_v28  ;;  %v5989_v22 = vcombine.low %v5954_v34, %v1947_v51  ;;  %v6714_v36 = vcombine.high %v5597_v25, %v5604_v31 }
 0x147   : > { %6712 = vst [vmem:[#allocation37_spill] sm:$0xff] %v5965_v12  ;;  %v2627_v50 = vcombine.high %v2619_v21, %v2619_v21  ;;  %v2635_v40 = vrot.slane %v2619_v21, %v5293_v19  ;;  %v5994_v54 = vrot.slane %v5974_v57, %v5293_v19  ;;  %v2733_v28 = vcombine.low %v5636_v56, %v5640_v59 }
 0x148   : > { %v2725_v12 = vrot.slane %v6713_v4, %v5293_v19  ;;  %v2732_v30 = vrot.slane %v6714_v36, %v5293_v19  ;;  %v2774_v49 = vrot.slane %v5689_v13, %v5293_v19  ;;  %v2781_v43 = vrot.slane %v5699_v3, %v5293_v19 }
 0x149   : > { %v2657_v51 = vcombine.high %v2635_v40, %v2635_v40  ;;  %v2664_v4 = vrot.slane %v2635_v40, %v5620_v48  ;;  %v2649_v21 = vrot.slane %v2627_v50, %v5293_v19  ;;  %v2741_v44 = vrot.slane %v2733_v28, %v5293_v19 }
 0x14a   : > { %v2734_v37 = vcombine.low %v2725_v12, %v2732_v30  ;;  %v2788_v25 = vrot.slane %v5701_v32, %v5293_v19  ;;  %v6715_v31 = vrot.slane %v5647_v62, %v5293_v19  ;;  %v2796_v13 = vcombine.low %v2774_v49, %v2781_v43 }
 0x14b   : > { %v2668_v59 = vrot.slane %v2649_v21, %v5620_v48  ;;  %v2819_v36 = vrot.slane %v5695_v26, %v5293_v19  ;;  %v2672_v3 = vrot.slane %v2657_v51, %v5620_v48  ;;  %v6716_v12 = vrot.slane %v5686_v2, %v5293_v19 }
 0x14c   : > { %v2763_v56 = vrot.slane %v6715_v31, %v5293_v19  ;;  %v2748_v30 = vrot.slane %v2734_v37, %v5293_v19  ;;  %v2859_v62 = vcombine.low %v5751_v61, %v5760_v7  ;;  %v2804_v40 = vrot.slane %v2796_v13, %v5293_v19 }
 0x14d   : > { %v2797_v32 = vcombine.low %v2788_v25, %v6716_v12  ;;  %v2826_v28 = vrot.slane %v2819_v36, %v5293_v19  ;;  %v2860_v43 = vcombine.low %v5770_v11, %v5782_v27  ;;  %v6717_v26 = vcombine.high %v5735_v0, %v5735_v0 }
 0x14e   : > { %v3222_v50 = vmul.f32 %v2763_v56, %v2664_v4  ;;  %v3159_v2 = vrot.slane %v5976_v9, %v5293_v19  ;;  %v2749_v49 = vcombine.low %v2741_v44, %v2748_v30  ;;  %v2867_v61 = vrot.slane %v2859_v62, %v5293_v19 }
 0x14f   : > { %v2882_v37 = vrot.slane %v6717_v26, %v5293_v19  ;;  %v2811_v51 = vrot.slane %v2797_v32, %v5293_v19  ;;  %v2628_v7 = vcombine.high %v5974_v57, %v5974_v57  ;;  %v3224_v25 = vmul.f32 %v2826_v28, %v2668_v59 }
 0x150   : > { %v2874_v31 = vrot.slane %v2860_v43, %v5293_v19  ;;  %v3221_v11 = vmul.f32 %v2749_v49, %v2664_v4  ;;  %v2985_v0 = vcombine.low %v5850_v45, %v5853_v47  ;;  %v2986_v44 = vcombine.low %v5856_v15, %v5859_v39 }
 0x151   : > { %v2889_v27 = vrot.slane %v2882_v37, %v5293_v19  ;;  %v2812_v56 = vcombine.low %v2804_v40, %v2811_v51  ;;  %v2680_v30 = vrot.slane %v5994_v54, %v5620_v48  ;;  %v3008_v57 = vrot.slane %v5827_v16, %v5293_v19 }
 0x152   : > { %v2875_v13 = vcombine.low %v2867_v61, %v2874_v31  ;;  %v3238_v12 = vsel %vm3237_vm9, %v3221_v11, 0.0  ;;  %v2993_v4 = vrot.slane %v2985_v0, %v5293_v19  ;;  %v3000_v62 = vrot.slane %v2986_v44, %v5293_v19 }
 0x153   : > { %v3226_v36 = vmul.f32 %v2889_v27, %v2672_v3  ;;  %v3223_v32 = vmul.f32 %v2812_v56, %v2668_v59  ;;  %v3166_v45 = vrot.slane %v5986_v38, %v5293_v19  ;;  %3239 = vadd.xlane.f32.xlu0 %v3238_v12  ;;  %v3015_v47 = vrot.slane %v3008_v57, %v5293_v19 }
 0x154   : > { %v3225_v15 = vmul.f32 %v2875_v13, %v2672_v3  ;;  %v2659_v39 = vcombine.high %v2649_v21, %v2649_v21  ;;  %v3001_v28 = vcombine.low %v2993_v4, %v3000_v62  ;;  %v2907_v16 = vrot.slane %v5784_v35, %v5293_v19 }
 0x155   : > { %v3245_v40 = vsel %vm3237_vm9, %v3223_v32, 0.0  ;;  %v6718_v59 = vrot.slane %v5824_v60, %v5293_v19  ;;  %v6719_v43 = vrot.slane %v5772_v1, %v5293_v19  ;;  %v3242_v38 = vsel %vm3241_vm10, %v3222_v50, 0.0 }
 0x156   : > { %3246 = vadd.xlane.f32.xlu1 %v3245_v40  ;;  %v3230_v3 = vmul.f32 %v3015_v47, %v2680_v30  ;;  %v2676_v37 = vrot.slane %v2659_v39, %v5620_v48  ;;  %v6720_v21 = vcombine.high %v5801_v14, %v5801_v14  ;;  %v3229_v51 = vmul.f32 %v3001_v28, %v2680_v30 }
 0x157   : > { %v2923_v26 = vcombine.low %v6719_v43, %v6718_v59  ;;  %v6721_v35 = vrot.slane %v5762_v5, %v5293_v19  ;;  %v2656_v1 = vrot.slane %v2628_v7, %v5293_v19  ;;  %3243 = vadd.xlane.f32.xlu0 %v3242_v38  ;;  %v3248_v50 = vsel %vm3241_vm10, %v3224_v25, 0.0 }
 0x158   : > { %v2945_v49 = vrot.slane %v6720_v21, %v5293_v19  ;;  %v3026_v27 = vrot.slane %v5870_v41, %v5293_v19  ;;  %v6722_v14 = vrot.slane %v5908_v20, %v5293_v19  ;;  %v6723_v11 = vrot.slane %v5888_v6, %v5293_v19 }
 0x159   : > { %v2922_v60 = vcombine.low %v6721_v35, %v2907_v16  ;;  %v2937_v61 = vrot.slane %v2923_v26, %v5293_v19  ;;  %v3251_v56 = vsel %vm3237_vm9, %v3225_v15, 0.0  ;;  %v2684_v7 = vrot.slane %v2656_v1, %v5620_v48 }
 0x15a   : > { %v2952_v31 = vrot.slane %v2945_v49, %v5293_v19  ;;  %v3049_v5 = vcombine.low %v6723_v11, %v6722_v14  ;;  %v3071_v25 = vrot.slane %v5876_v24, %v5293_v19  ;;  %3249 = vadd.xlane.f32.xlu1 %v3248_v50  ;;  %v6724_v41 = vrot.slane %v5847_v52, %v5293_v19  ;;  %v6730_v14 = vld [vmem:[#allocation31_spill] sm:$0xff] }
 0x15b   : > { %v2930_v0 = vrot.slane %v2922_v60, %v5293_v19  ;;  %v2658_v6 = vcombine.high %v5994_v54, %v5994_v54  ;;  %v3111_v12 = vcombine.low %v5933_v23, %v5941_v42  ;;  %v3112_v24 = vcombine.low %v5951_v33, %v5957_v46  ;;  %3252 = vadd.xlane.f32.xlu0 %v3251_v56 }
 0x15c   : > { %v3228_v44 = vmul.f32 %v2952_v31, %v2676_v37  ;;  %v3048_v13 = vcombine.low %v3026_v27, %v6724_v41  ;;  %v3063_v20 = vrot.slane %v3049_v5, %v5293_v19  ;;  %v3078_v57 = vrot.slane %v3071_v25, %v5293_v19  ;;  %v6731_v5 = vld [vmem:[#allocation35_spill] sm:$0xff] }
 0x15d   : > { %v2938_v30 = vcombine.low %v2930_v0, %v2937_v61  ;;  %v3254_v32 = vsel %vm3241_vm10, %v3226_v36, 0.0  ;;  %v2688_v4 = vrot.slane %v2658_v6, %v5620_v48  ;;  %v6725_v54 = vcombine.high %v5892_v17, %v5892_v17  ;;  %v6732_v0 = vld [vmem:[#allocation36_spill] sm:$0xff] }
 0x15e   : > { %v3056_v52 = vrot.slane %v3048_v13, %v5293_v19  ;;  %v3232_v47 = vmul.f32 %v3078_v57, %v2684_v7  ;;  %v3119_v39 = vrot.slane %v3111_v12, %v5293_v19  ;;  %v3126_v23 = vrot.slane %v3112_v24, %v5293_v19  ;;  %3255 = vadd.xlane.f32.xlu1 %v3254_v32 }
 0x15f   : > { %v3134_v62 = vrot.slane %v6725_v54, %v5293_v19  ;;  %v3227_v15 = vmul.f32 %v2938_v30, %v2676_v37  ;;  %v6726_v46 = vcombine.high %v5918_v8, %v5918_v8  ;;  %v3173_v40 = vrot.slane %v5989_v22, %v5293_v19  ;;  %v6734_v30 = vld [vmem:[#allocation32_spill] sm:$0xff]  ;;  %v6738_v54 = vld [vmem:[#allocation15_spill] sm:$0xff] }
 0x160   : > { %v3064_v33 = vcombine.low %v3056_v52, %v3063_v20  ;;  %v3263_v17 = vsel %vm3237_vm9, %v3229_v51, 0.0  ;;  %v3127_v28 = vcombine.low %v3119_v39, %v3126_v23  ;;  %v2660_v16 = vcombine.high %v2656_v1, %v2656_v1  ;;  %v6736_v52 = vld [vmem:[#allocation12_spill] sm:$0xff] }
 0x161   : > { %v2502_v42 = vrot.slane %v6726_v46, %v5293_v19  ;;  %v3141_v36 = vrot.slane %v3134_v62, %v5293_v19  ;;  %v6727_v59 = vrot.slane %v5926_v53, %v5293_v19  ;;  %v2495_v8 = vrot.slane %v5944_v29, %v5293_v19  ;;  %3264 = vadd.xlane.f32.xlu0 %v3263_v17 }
 0x162   : > { %v3231_v26 = vmul.f32 %v3064_v33, %v2684_v7  ;;  %v3175_v37 = vcombine.low %v3166_v45, %v3173_v40  ;;  %v3266_v22 = vsel %vm3241_vm10, %v3230_v3, 0.0  ;;  %v3233_v21 = vmul.f32 %v3127_v28, %v2688_v4  ;;  %v6742_v28 = vld [vmem:[#allocation34_spill] sm:$0xff] }
 0x163   : > { %v3174_v43 = vcombine.low %v6727_v59, %v3159_v2  ;;  %v3234_v38 = vmul.f32 %v3141_v36, %v2688_v4  ;;  %v1949_v51 = vcombine.high %v5954_v34, %v5954_v34  ;;  %v4040_v9 = vcombine.low %v5960_v18, %v5906_v63  ;;  %3267 = vadd.xlane.f32.xlu1 %v3266_v22  ;;  %v6740_v36 = vld [vmem:[#allocation10_spill] sm:$0xff] }
 0x164   : > { %v2510_v53 = vcombine.high %v5948_v10, %v5948_v10  ;;  %v2512_v2 = vcombine.high %v2502_v42, %v2502_v42  ;;  %v3189_v35 = vrot.slane %v3175_v37, %v5293_v19  ;;  %v6728_v45 = vcombine.low %v5936_v58, %v5923_v55 }
 0x165   : > { %v3182_v49 = vrot.slane %v3174_v43, %v5293_v19  ;;  %v3257_v60 = vsel %vm3237_vm9, %v3227_v15, 0.0  ;;  %v2692_v61 = vrot.slane %v2660_v16, %v5620_v48  ;;  %v3197_v34 = vrot.slane %v1949_v51, %v5293_v19  ;;  %v6739_v15 = vld [vmem:[#allocation37_spill] sm:$0xff] }
 0x166   : > { %v4054_v3 = vrot.slane %v6728_v45, %v5293_v19  ;;  %v6729_v63 = vcombine.high %v5944_v29, %v5944_v29  ;;  %v2511_v1 = vcombine.high %v2495_v8, %v2495_v8  ;;  %3258 = vadd.xlane.f32.xlu0 %v3257_v60  ;;  %v3260_v50 = vsel %vm3241_vm10, %v3228_v44, 0.0  ;;  %v6743_v16 = vld [vmem:[#allocation33_spill] sm:$0xff]  ;;  %v6746_v60 = vld [vmem:[#allocation14_spill] sm:$0xff] }
 0x167   : > { %v3190_v31 = vcombine.low %v3182_v49, %v3189_v35  ;;  %v3204_v27 = vrot.slane %v3197_v34, %v5293_v19  ;;  %v3984_v11 = vrot.slane %v6730_v14, %v5293_v19  ;;  %v3998_v56 = vrot.slane %v6731_v5, %v5293_v19  ;;  %3261 = vadd.xlane.f32.xlu1 %v3260_v50 }
 0x168   : > { %v6146_v10 = vrot.slane %v6729_v63, %v5293_v19  ;;  %v4005_v7 = vrot.slane %v6732_v0, %v5293_v19  ;;  %v6733_v29 = vcombine.high %v5936_v58, %v5923_v55  ;;  %v4101_v41 = vcombine.low %v2502_v42, %v2510_v53  ;;  %v6737_v55 = vld [vmem:[#allocation13_spill] sm:$0xff] }
 0x169   : > { %v4102_v13 = vcombine.low %v2512_v2, %v2495_v8  ;;  %v3235_v44 = vmul.f32 %v3190_v31, %v2692_v61  ;;  %v3269_v20 = vsel %vm3237_vm9, %v3231_v26, 0.0  ;;  %v3236_v6 = vmul.f32 %v3204_v27, %v2692_v61  ;;  %v6749_v31 = vld [vmem:[#allocation29_spill] sm:$0xff]  ;;  %v6750_v27 = vld [vmem:[#allocation28_spill] sm:$0xff] }
 0x16a   : > { %v4061_v25 = vrot.slane %v6733_v29, %v5293_v19  ;;  %v6735_v57 = vrot.slane %v6734_v30, %v5293_v19  ;;  %v4007_v24 = vcombine.low %v3998_v56, %v4005_v7  ;;  %v4103_v32 = vcombine.low %v6146_v10, %v2511_v1  ;;  %3270 = vadd.xlane.f32.xlu0 %v3269_v20  ;;  %v6752_v0 = vld [vmem:[#allocation17_spill] sm:$0xff] }
 0x16b   : > { %v3732_v4 = vrot.slane %v6736_v52, %v5293_v19  ;;  %v3739_v58 = vrot.slane %v6737_v55, %v5293_v19  ;;  %v3746_v62 = vrot.slane %v6738_v54, %v5293_v19  ;;  %v4110_v39 = vrot.slane %v6739_v15, %v5293_v19  ;;  %v6755_v30 = vld [vmem:[#allocation21_spill] sm:$0xff] }
 0x16c   : > { %v4006_v12 = vcombine.low %v3984_v11, %v6735_v57  ;;  %v3272_v23 = vsel %vm3241_vm10, %v3232_v47, 0.0  ;;  %v4021_v42 = vrot.slane %v4007_v24, %v5293_v19  ;;  %v6741_v40 = vrot.slane %v6740_v36, %v5293_v19  ;;  %v6757_v54 = vld [vmem:[#allocation25_spill] sm:$0xff] }
 0x16d   : > { %3273 = vadd.xlane.f32.xlu1 %v3272_v23  ;;  %v3754_v33 = vcombine.low %v3732_v4, %v3739_v58  ;;  %v6744_v59 = vcombine.high %v6742_v28, %v6743_v16  ;;  %v4068_v8 = vrot.slane %v4040_v9, %v5293_v19  ;;  %v3275_v26 = vsel %vm3237_vm9, %v3233_v21, 0.0  ;;  %v6745_v21 = vld [vmem:[#allocation16_spill] sm:$0xff]  ;;  %v6760_v23 = vld [vmem:[#allocation19_spill] sm:$0xff] }
 0x16e   : > { %v4014_v46 = vrot.slane %v4006_v12, %v5293_v19  ;;  %v3755_v17 = vcombine.low %v3746_v62, %v6741_v40  ;;  %v4117_v37 = vrot.slane %v4101_v41, %v5293_v19  ;;  %v4124_v22 = vrot.slane %v4102_v13, %v5293_v19  ;;  %3276 = vadd.xlane.f32.xlu0 %v3275_v26  ;;  %v6754_v13 = vld [vmem:[#allocation24_spill] sm:$0xff]  ;;  %v6758_v62 = vld [vmem:[#allocation22_spill] sm:$0xff] }
 0x16f   : > { %v4047_v43 = vrot.slane %v6744_v59, %v5293_v19  ;;  %v3762_v49 = vrot.slane %v3754_v33, %v5293_v19  ;;  %v4070_v2 = vcombine.low %v4061_v25, %v4068_v8  ;;  %v3278_v35 = vsel %vm3241_vm10, %v3234_v38, 0.0  ;;  %v6753_v25 = vld [vmem:[#allocation23_spill] sm:$0xff]  ;;  %v6763_v40 = vld [vmem:[#allocation30_spill] sm:$0xff] }
 0x170   : > { %v6185_v47 = vcombine.low %v4014_v46, %v4021_v42  ;;  %v3769_v51 = vrot.slane %v3755_v17, %v5293_v19  ;;  %v4131_v45 = vrot.slane %v4103_v32, %v5293_v19  ;;  %v4132_v9 = vcombine.low %v4110_v39, %v4117_v37  ;;  %v6756_v32 = vld [vmem:[#allocation26_spill] sm:$0xff] }
 0x171   : > { %v4069_v53 = vcombine.low %v4047_v43, %v4054_v3  ;;  %v6747_v61 = vcombine.low %v6745_v21, %v6746_v60  ;;  %3279 = vadd.xlane.f32.xlu1 %v3278_v35  ;;  %v6203_v50 = vrot.slane %v4070_v2, %v5293_v19  ;;  %v6748_v38 = vcombine.high %v6745_v21, %v6746_v60 }
 0x172   : > { %v6197_v63 = vcombine.low %v3762_v49, %v3769_v51  ;;  %v6751_v14 = vcombine.high %v6749_v31, %v6750_v27  ;;  %v3281_v5 = vsel %vm3237_vm9, %v3235_v44, 0.0  ;;  %v4133_v56 = vcombine.low %v4124_v22, %v4131_v45 }
 0x173   : > { %v3802_v34 = vrot.slane %v6747_v61, %v5293_v19  ;;  %v6200_v1 = vrot.slane %v4069_v53, %v5293_v19  ;;  %v3809_v3 = vrot.slane %v6748_v38, %v5293_v19  ;;  %3282 = vadd.xlane.f32.xlu0 %v3281_v5  ;;  %v3858_v20 = vrot.slane %v6754_v13, %v5293_v19  ;;  %v6765_v5 = vld [vmem:[#allocation6_spill] sm:$0xff] }
 0x174   : > { %v3942_v11 = vrot.slane %v6751_v14, %v5293_v19  ;;  %v3865_v57 = vrot.slane %v6755_v30, %v5293_v19  ;;  %v3284_v12 = vsel %vm3241_vm10, %v3236_v6, 0.0  ;;  %v4140_v24 = vrot.slane %v4132_v9, %v5293_v19 }
 0x175   : > { %v3817_v7 = vcombine.low %v6752_v0, %v3802_v34  ;;  %v4085_v29 = vcombine.low %v6200_v1, %v6203_v50  ;;  %v3818_v41 = vcombine.low %v3809_v3, %v6753_v25  ;;  %v4147_v44 = vrot.slane %v4133_v56, %v5293_v19  ;;  %3285 = vadd.xlane.f32.xlu1 %v3284_v12 }
 0x176   : > { %v3879_v52 = vrot.slane %v6756_v32, %v5293_v19  ;;  %v3880_v58 = vcombine.low %v3858_v20, %v3865_v57  ;;  %v6759_v15 = vcombine.low %v6757_v54, %v6758_v62  ;;  %v6761_v46 = vrot.slane %v6760_v23, %v5293_v19 }
 0x177   : > { %v6228_v4 = vrot.slane %v3817_v7, %v5293_v19  ;;  %v6231_v55 = vrot.slane %v3818_v41, %v5293_v19  ;;  %v6237_v39 = vcombine.low %v4140_v24, %v4147_v44  ;;  %v6762_v33 = vcombine.high %v6757_v54, %v6758_v62 }
 0x178   : > { %v3921_v6 = vrot.slane %v6759_v15, %v5293_v19  ;;  %v3881_v42 = vcombine.low %v6761_v46, %v3879_v52  ;;  %v3944_v17 = vcombine.low %v6763_v40, %v3942_v11  ;;  %v3888_v59 = vrot.slane %v3880_v58, %v5293_v19 }
 0x179   : > { %v3928_v36 = vrot.slane %v6762_v33, %v5293_v19  ;;  %v3833_v28 = vcombine.low %v6228_v4, %v6231_v55  ;;  %v6764_v60 = vlaneseq }
 0x17a   : > { %v3895_v43 = vrot.slane %v3881_v42, %v5293_v19  ;;  %v6252_v26 = vrot.slane %v3944_v17, %v5293_v19 }
 0x17b   : > { %v3943_v8 = vcombine.low %v3921_v6, %v3928_v36  ;;  %v3320_v61 = vand.u32 127, %v6764_v60 }
 0x17c   : > { %v6254_v37 = vcombine.low %v3888_v59, %v3895_v43 }
 0x17d   : > { %v6257_v22 = vrot.slane %v3943_v8, %v5293_v19  ;;  %v3325_v38 = vadd.s32 4294967288, %v3320_v61  ;;  %v6278_v13 = vsub.s32 %v3320_v61, %v6765_v5 }
 0x17f   : > { %v3959_v49 = vcombine.low %v6257_v22, %v6252_v26  ;;  %v6269_v56 = vsub.s32 %v3325_v38, %v6765_v5 }
 0x1e0   : > { %v3240_v51 = vpop.xlane.xlu0 %3239 }
 0x1e1   : > { %v6280_v20 = vmul.f32 0.35355338, %v3240_v51 }
 0x1e3   : > { %v3247_v53 = vpop.xlane.xlu1 %3246  ;;  %v3324_v6 = vrot.slane %v6280_v20, %v6278_v13 }
 0x1e4   : > { %v3244_v2 = vpop.xlane.xlu0 %3243  ;;  %v6266_v11 = vmul.f32 0.35355338, %v3247_v53 }
 0x1e5   : > { %v6271_v0 = vmul.f32 0.35355338, %v3244_v2 }
 0x1e6   : > { %v3335_v44 = vrot.slane %v6266_v11, %v6278_v13 }
 0x1e7   : > { %v3250_v35 = vpop.xlane.xlu1 %3249  ;;  %v3329_v32 = vrot.slane %v6271_v0, %v6269_v56 }
 0x1e8   : > { %v3253_v45 = vpop.xlane.xlu0 %3252  ;;  %v6262_v31 = vmul.f32 0.35355338, %v3250_v35 }
 0x1e9   : > { %v6275_v25 = vmul.f32 0.35355338, %v3253_v45  ;;  %v3331_v59 = vsel %vm3330_vm11, %v3329_v32, %v3324_v6 }
 0x1ea   : > { %v3339_v30 = vrot.slane %v6262_v31, %v6269_v56 }
 0x1eb   : > { %v3256_v9 = vpop.xlane.xlu1 %3255  ;;  %v3344_v54 = vrot.slane %v6275_v25, %v6278_v13 }
 0x1ec   : > { %v6264_v27 = vmul.f32 0.35355338, %v3256_v9  ;;  %v3340_v23 = vsel %vm3330_vm11, %v3339_v30, %v3335_v44 }
 0x1ed   : > { %v3395_v53 = vsel %vm2519_vm2, %v3340_v23, %v3331_v59 }
 0x1ee   : > { %v3265_v21 = vpop.xlane.xlu0 %3264  ;;  %v3348_v12 = vrot.slane %v6264_v27, %v6269_v56 }
 0x1ef   : > { %v6308_v36 = vmul.f32 0.35355338, %v3265_v21 }
 0x1f0   : > { %v3268_v34 = vpop.xlane.xlu1 %3267  ;;  %v3349_v33 = vsel %vm3330_vm11, %v3348_v12, %v3344_v54 }
 0x1f1   : > { %v6298_v62 = vmul.f32 0.35355338, %v3268_v34  ;;  %v3396_v45 = vsel %vm2522_vm3, %v3349_v33, %v3395_v53  ;;  %v3362_v61 = vrot.slane %v6308_v36, %v6278_v13  ;;  %v3414_v33 = vsub.s32 1, %v6765_v5 }
 0x1f3   : > { %v3259_v3 = vpop.xlane.xlu0 %3258  ;;  %v3366_v2 = vrot.slane %v6298_v62, %v6269_v56 }
 0x1f4   : > { %v3262_v14 = vpop.xlane.xlu1 %3261  ;;  %v6284_v57 = vmul.f32 0.35355338, %v3259_v3 }
 0x1f5   : > { %v6273_v7 = vmul.f32 0.35355338, %v3262_v14  ;;  %v3367_v30 = vsel %vm3330_vm11, %v3366_v2, %v3362_v61 }
 0x1f6   : > { %v3353_v46 = vrot.slane %v6284_v57, %v6278_v13 }
 0x1f7   : > { %v3271_v41 = vpop.xlane.xlu0 %3270  ;;  %v3357_v52 = vrot.slane %v6273_v7, %v6269_v56 }
 0x1f8   : > { %v6305_v42 = vmul.f32 0.35355338, %v3271_v41 }
 0x1f9   : > { %v3358_v43 = vsel %vm3330_vm11, %v3357_v52, %v3353_v46  ;;  %v5146_v46 = vmov 0  }
 0x1fa   : > { %v3274_v24 = vpop.xlane.xlu1 %3273  ;;  %v3371_v9 = vrot.slane %v6305_v42, %v6278_v13  ;;  %v3397_v34 = vsel %vm2525_vm4, %v3358_v43, %v3396_v45  ;;  %5035 = vset.pattern.permute.xlu0 %v5146_v46  ;;  %5034 = vset.pattern.permute.xlu1 %v5146_v46 }
 0x1fb   : > { %v6294_v58 = vmul.f32 0.35355338, %v3274_v24  ;;  %v3277_v15 = vpop.xlane.xlu0 %3276  ;;  %v3398_v32 = vsel %vm2528_vm5, %v3367_v30, %v3397_v34 }
 0x1fc   : > { %v6310_v40 = vmul.f32 0.35355338, %v3277_v15 }
 0x1fd   : > { %v3375_v8 = vrot.slane %v6294_v58, %v6269_v56 }
 0x1fe   : > { %v3280_v17 = vpop.xlane.xlu1 %3279  ;;  %v3380_v38 = vrot.slane %v6310_v40, %v6278_v13 }
 0x1ff   : > { %v6316_v51 = vmul.f32 0.35355338, %v3280_v17  ;;  %v3376_v14 = vsel %vm3330_vm11, %v3375_v8, %v3371_v9  ;;  %v3430_v8 = vsub.s32 5, %v6765_v5  ;;  %v3434_v9 = vsub.s32 6, %v6765_v5 }
 0x200   : > { %v3283_v35 = vpop.xlane.xlu0 %3282  ;;  %v3399_v52 = vsel %vm2531_vm6, %v3376_v14, %v3398_v32 }
 0x201   : > { %v3384_v21 = vrot.slane %v6316_v51, %v6269_v56  ;;  %v6326_v60 = vmul.f32 0.35355338, %v3283_v35  ;;  %v3418_v35 = vsub.s32 2, %v6765_v5 }
 0x202   : > { %v3286_v3 = vpop.xlane.xlu1 %3285 }
 0x203   : > { %v6334_v41 = vmul.f32 0.35355338, %v3286_v3  ;;  %v3385_v12 = vsel %vm3330_vm11, %v3384_v21, %v3380_v38  ;;  %v3389_v24 = vrot.slane %v6326_v60, %v6278_v13 }
 0x204   : > { %v3400_v15 = vsel %vm2534_vm7, %v3385_v12, %v3399_v52 }
 0x205   : > { %v3393_v44 = vrot.slane %v6334_v41, %v6269_v56 }
 0x207   : > { %v3394_v54 = vsel %vm3330_vm11, %v3393_v44, %v3389_v24 }
 0x208   : > { %v3401_v6 = vsel %vm2537_vm8, %v3394_v54, %v3400_v15 }
 0x209   : > { %v3404_v23 = vsel %vm3403_vm12, %v3401_v6, -inf }
 0x20a   : > { %3405 = vmax.xlane.f32.xlu0 %v3404_v23 }
 0x297   : > { %v3406_v17 = vpop.xlane.xlu0 %3405 }
 0x298   : > { %v3411_v59 = vrot.slane %v3406_v17, %v5620_v48  ;;  %v3415_v43 = vrot.slane %v3406_v17, %v3414_v33  ;;  %v6356_v21 = vrot.slane %v3406_v17, %v3430_v8  ;;  %v3419_v38 = vrot.slane %v3406_v17, %v3418_v35 }
 0x299   : > { %v6360_v14 = vrot.slane %v3406_v17, %v3434_v9 }
 0x29a   : > { %v3448_v53 = vsub.f32 %v6280_v20, %v3411_v59  ;;  %v3449_v2 = vsub.f32 %v6271_v0, %v3411_v59  ;;  %v3450_v45 = vsub.f32 %v6266_v11, %v3415_v43  ;;  %v3451_v48 = vsub.f32 %v6262_v31, %v3415_v43 }
 0x29b   : > { %v3438_v20 = vsub.s32 7, %v6765_v5  ;;  %v3458_v0 = vsub.f32 %v6305_v42, %v6356_v21  ;;  %v3422_v11 = vsub.s32 3, %v6765_v5  ;;  %v3452_v30 = vsub.f32 %v6275_v25, %v3419_v38 }
 0x29c   : > { %v3464_v61 = vmul.f32 1.442695, %v3448_v53  ;;  %v3466_v34 = vmul.f32 1.442695, %v3449_v2  ;;  %v3468_v3 = vmul.f32 1.442695, %v3450_v45  ;;  %v3460_v31 = vsub.f32 %v6310_v40, %v6360_v14 }
 0x29d   : > { %v3470_v12 = vmul.f32 1.442695, %v3451_v48  ;;  %v3439_v24 = vrot.slane %v3406_v17, %v3438_v20  ;;  %v3484_v44 = vmul.f32 1.442695, %v3458_v0  ;;  %v3423_v32 = vrot.slane %v3406_v17, %v3422_v11 }
 0x29e   : > { %5044 = vpow2.f32 %v3464_v61  ;;  %v3453_v52 = vsub.f32 %v6264_v27, %v3419_v38  ;;  %v3472_v54 = vmul.f32 1.442695, %v3452_v30  ;;  %v3488_v42 = vmul.f32 1.442695, %v3460_v31 }
 0x29f   : > { %5046 = vpow2.f32 %v3466_v34  ;;  %v3462_v6 = vsub.f32 %v6326_v60, %v3439_v24  ;;  %v3426_v25 = vsub.s32 4, %v6765_v5  ;;  %v3454_v46 = vsub.f32 %v6284_v57, %v3423_v32 }
 0x2a0   : > { %5048 = vpow2.f32 %v3468_v3  ;;  %v3474_v33 = vmul.f32 1.442695, %v3453_v52  ;;  %v3455_v43 = vsub.f32 %v6273_v7, %v3423_v32  ;;  %v3459_v61 = vsub.f32 %v6294_v58, %v6356_v21 }
 0x2a1   : > { %5050 = vpow2.f32 %v3470_v12  ;;  %v3492_v59 = vmul.f32 1.442695, %v3462_v6  ;;  %v3427_v27 = vrot.slane %v3406_v17, %v3426_v25  ;;  %v3476_v60 = vmul.f32 1.442695, %v3454_v46 }
 0x2a2   : > { %5052 = vpow2.f32 %v3484_v44  ;;  %v3478_v57 = vmul.f32 1.442695, %v3455_v43  ;;  %v3461_v38 = vsub.f32 %v6316_v51, %v6360_v14  ;;  %v3486_v48 = vmul.f32 1.442695, %v3459_v61  ;;  %v6766_v14 = vld [vmem:[#allocation8_spill] sm:$0xff]  ;;  %v6768_v61 = vld [vmem:[#allocation11_spill] sm:$0xff] }
 0x2a3   : > { %5054 = vpow2.f32 %v3472_v54  ;;  %v3456_v5 = vsub.f32 %v6308_v36, %v3427_v27  ;;  %v3457_v45 = vsub.f32 %v6298_v62, %v3427_v27  ;;  %v3463_v3 = vsub.f32 %v6334_v41, %v3439_v24 }
 0x2a4   : > { %5056 = vpow2.f32 %v3488_v42  ;;  %v3490_v20 = vmul.f32 1.442695, %v3461_v38  ;;  %v2073_v12 = vcombine.high %v6766_v14, %v6766_v14  ;;  %v2080_v24 = vrot.slane %v6766_v14, %v5293_v19 }
 0x2a5   : > { %5058 = vpow2.f32 %v3474_v33  ;;  %v3480_v17 = vmul.f32 1.442695, %v3456_v5  ;;  %v3482_v34 = vmul.f32 1.442695, %v3457_v45  ;;  %v3494_v58 = vmul.f32 1.442695, %v3463_v3 }
 0x2a6   : > { %5060 = vpow2.f32 %v3492_v59  ;;  %v2087_v41 = vrot.slane %v2073_v12, %v5293_v19  ;;  %v2088_v44 = vcombine.high %v2080_v24, %v2080_v24 }
 0x2a7   : > { %5062 = vpow2.f32 %v3476_v60 }
 0x2a8   : > { %v5045_v15 = vpop.eup %5044  ;;  %5064 = vpow2.f32 %v3478_v57  ;;  %v2089_v31 = vcombine.high %v2087_v41, %v2087_v41  ;;  %v2103_v52 = vrot.slane %v2087_v41, %v5293_v19  ;;  %v2110_v54 = vrot.slane %v2088_v44, %v5293_v19  ;;  %v6770_v44 = vld [vmem:[#allocation20_spill] sm:$0xff] }
 0x2a9   : > { %v5047_v23 = vpop.eup %5046  ;;  %3513 = vperm.xlu1 %5034, %v5045_v15   ;;  %5066 = vpow2.f32 %v3480_v17  ;;  %v2096_v15 = vrot.slane %v2080_v24, %v5293_v19 }
 0x2aa   : > { %3516 = vperm.xlu0 %5035, %v5047_v23   ;;  %v5049_v40 = vpop.eup %5048  ;;  %5068 = vpow2.f32 %v3482_v34  ;;  %v2117_v32 = vrot.slane %v2089_v31, %v5293_v19  ;;  %v3777_v34 = vrot.slane %v6768_v61, %v5293_v19 }
 0x2ab   : > { %v5051_v8 = vpop.eup %5050  ;;  %5070 = vpow2.f32 %v3486_v48  ;;  %v3659_v23 = vcombine.low %v2096_v15, %v2110_v54  ;;  %v4767_v25 = vcombine.high %v2096_v15, %v2110_v54 }
 0x2ac   : > { %v5053_v53 = vpop.eup %5052  ;;  %5072 = vpow2.f32 %v3490_v20  ;;  %v3661_v6 = vcombine.low %v2103_v52, %v2117_v32  ;;  %v4768_v42 = vcombine.high %v2103_v52, %v2117_v32  ;;  %v3784_v3 = vrot.slane %v3777_v34, %v5293_v19  ;;  %v6769_v20 = vld [vmem:[#allocation18_spill] sm:$0xff] }
 0x2ad   : > { %3519 = vperm.xlu1 %5034, %v5049_v40   ;;  %v5055_v2 = vpop.eup %5054  ;;  %5074 = vpow2.f32 %v3494_v58  ;;  %v3669_v40 = vrot.slane %v3659_v23, %v5293_v19  ;;  %v3676_v59 = vrot.slane %v4767_v25, %v5293_v19  ;;  %v2316_v32 = vcombine.high %v6770_v44, %v6770_v44 }
 0x2ae   : > { %3543 = vperm.xlu0 %5035, %v5053_v53   ;;  %v5057_v35 = vpop.eup %5056  ;;  %v3683_v46 = vrot.slane %v3661_v6, %v5293_v19  ;;  %v3690_v33 = vrot.slane %v4768_v42, %v5293_v19 }
 0x2af   : > { %v5059_v7 = vpop.eup %5058  ;;  %v3691_v43 = vcombine.low %v3669_v40, %v3676_v59  ;;  %v3903_v6 = vrot.slane %v2316_v32, %v5293_v19 }
 0x2b0   : > { %v5061_v9 = vpop.eup %5060  ;;  %v3692_v27 = vcombine.low %v3683_v46, %v3690_v33  ;;  %v6771_v33 = vld [vmem:[#allocation27_spill] sm:$0xff] }
 0x2b1   : > { %3522 = vperm.xlu1 %5034, %v5051_v8   ;;  %v5063_v36 = vpop.eup %5062  ;;  %v6767_v8 = vld [vmem:[#allocation9_spill] sm:$0xff]  ;;  %v3699_v5 = vrot.slane %v3691_v43, %v5293_v19  ;;  %v3910_v1 = vrot.slane %v3903_v6, %v5293_v19  ;;  %v3966_v40 = vrot.slane %v6771_v33, %v5293_v19 }
 0x2b2   : > { %3549 = vperm.xlu0 %5035, %v5057_v35   ;;  %v5065_v62 = vpop.eup %5064  ;;  %v3706_v60 = vrot.slane %v3692_v27, %v5293_v19  ;;  %v3714_v53 = vrot.slane %v6767_v8, %v5293_v19 }
 0x2b3   : > { %v5067_v0 = vpop.eup %5066  ;;  %v3973_v8 = vrot.slane %v3966_v40, %v5293_v19 }
 0x2b4   : > { %v5069_v21 = vpop.eup %5068  ;;  %v3707_v57 = vcombine.low %v3699_v5, %v3706_v60  ;;  %v2513_v60 = vcombine.high %v6146_v10, %v6146_v10 }
 0x2b5   : > { %3525 = vperm.xlu1 %5034, %v5055_v2   ;;  %v5071_v11 = vpop.eup %5070  ;;  %v3721_v2 = vrot.slane %v3714_v53, %v5293_v19  ;;  %v4029_v53 = vrot.slane %v6743_v16, %v5293_v19 }
 0x2b6   : > { %3555 = vperm.xlu0 %5035, %v5061_v9   ;;  %v5073_v30 = vpop.eup %5072  ;;  %v4155_v26 = vrot.slane %v2513_v60, %v5293_v19 }
 0x2b7   : > { %v5075_v51 = vpop.eup %5074 }
 0x2b9   : > { %3528 = vperm.xlu1 %5034, %v5059_v7  }
 0x2bd   : > { %3531 = vperm.xlu1 %5034, %v5063_v36  }
 0x2c1   : > { %3534 = vperm.xlu1 %5034, %v5065_v62  }
 0x2c5   : > { %3537 = vperm.xlu1 %5034, %v5067_v0   ;;  %v2265_v0 = vcombine.high %v6769_v20, %v6769_v20 }
 0x2c7   : > { %v3840_v41 = vrot.slane %v2265_v0, %v5293_v19  ;;  %v4162_v0 = vrot.slane %v4155_v26, %v5293_v19 }
 0x2c9   : > { %3540 = vperm.xlu1 %5034, %v5069_v21   ;;  %v3847_v52 = vrot.slane %v3840_v41, %v5293_v19 }
 0x2cd   : > { %3546 = vperm.xlu1 %5034, %v5071_v11  }
 0x2d1   : > { %3552 = vperm.xlu1 %5034, %v5073_v30  }
 0x2d5   : > { %3558 = vperm.xlu1 %5034, %v5075_v51  }
 0x328   : > { %v6398_v35 = vpop.permute.xlu1 %3513 }
 0x329   : > { %v6400_v45 = vpop.permute.xlu0 %3516  ;;  %v4179_v17 = vmul.f32 %v3707_v57, %v6398_v35  ;;  %v3563_v16 = vrot.slane %v6398_v35, %v6278_v13 }
 0x32a   : > { %v4180_v7 = vmul.f32 %v3721_v2, %v6400_v45  ;;  %v3567_v10 = vrot.slane %v6400_v45, %v6269_v56 }
 0x32b   : > { %v4195_v9 = vsel %vm3237_vm9, %v4179_v17, 0.0 }
 0x32c   : > { %v4196_v36 = vsel %vm3241_vm10, %v4180_v7, 0.0  ;;  %v3520_v38 = vpop.permute.xlu1 %3519 }
 0x32d   : > { %v6408_v48 = vadd.f32 %v4196_v36, %v4195_v9  ;;  %v4181_v62 = vmul.f32 %v6197_v63, %v3520_v38  ;;  %v6414_v11 = vpop.permute.xlu0 %3543  ;;  %v3572_v7 = vrot.slane %v3520_v38, %v6278_v13 }
 0x32e   : > { %v4189_v30 = vmul.f32 %v6185_v47, %v6414_v11 }
 0x32f   : > { %v4204_v51 = vsel %vm3237_vm9, %v4181_v62, 0.0 }
 0x330   : > { %v3523_v58 = vpop.permute.xlu1 %3522  ;;  %v4240_v45 = vsel %vm3237_vm9, %v4189_v30, 0.0 }
 0x331   : > { %v4182_v21 = vmul.f32 %v3784_v3, %v3523_v58  ;;  %v6423_v24 = vpop.permute.xlu0 %3549  ;;  %v3576_v2 = vrot.slane %v3523_v58, %v6269_v56 }
 0x332   : > { %v4191_v47 = vmul.f32 %v4085_v29, %v6423_v24 }
 0x333   : > { %v4205_v14 = vsel %vm3241_vm10, %v4182_v21, 0.0  ;;  %v3577_v62 = vsel %vm3330_vm11, %v3576_v2, %v3572_v7  ;;  %v3568_v21 = vsel %vm3330_vm11, %v3567_v10, %v3563_v16  ;;  %v4389_v2 = vld [vmem:[%s6641_s5 + $0x8] sm:$0xff] }
 0x334   : > { %v3526_v12 = vpop.permute.xlu1 %3525  ;;  %v6421_v63 = vadd.f32 %v4205_v14, %v4204_v51 }
 0x335   : > { %v4183_v31 = vmul.f32 %v3833_v28, %v3526_v12  ;;  %v3581_v35 = vrot.slane %v3526_v12, %v6278_v13  ;;  %v3556_v51 = vpop.permute.xlu0 %3555 }
 0x336   : > { %v4207_v10 = vrot.slane %v6421_v63, 4 }
 0x337   : > { %v4213_v42 = vsel %vm3237_vm9, %v4183_v31, 0.0 }
 0x338   : > { %v3529_v54 = vpop.permute.xlu1 %3528 }
 0x339   : > { %v4184_v15 = vmul.f32 %v3847_v52, %v3529_v54  ;;  %v3585_v34 = vrot.slane %v3529_v54, %v6269_v56  ;;  %v3608_v52 = vrot.slane %v6414_v11, %v6278_v13  ;;  %v3617_v54 = vrot.slane %v6423_v24, %v6278_v13 }
 0x33b   : > { %v4214_v23 = vsel %vm3241_vm10, %v4184_v15, 0.0  ;;  %v3586_v32 = vsel %vm3330_vm11, %v3585_v34, %v3581_v35  ;;  %v3632_v15 = vsel %vm2519_vm2, %v3577_v62, %v3568_v21  ;;  %v4208_v62 = vadd.f32 %v4207_v10, %v6421_v63 }
 0x33c   : > { %v3532_v4 = vpop.permute.xlu1 %3531  ;;  %v6438_v55 = vadd.f32 %v4214_v23, %v4213_v42  ;;  %v4249_v42 = vsel %vm3237_vm9, %v4191_v47, 0.0  ;;  %v4193_v23 = vmul.f32 %v6237_v39, %v3556_v51 }
 0x33d   : > { %v4185_v28 = vmul.f32 %v6254_v37, %v3532_v4  ;;  %v2462_v37 = vcombine.high %v5960_v18, %v5960_v18  ;;  %v3590_v14 = vrot.slane %v3532_v4, %v6278_v13  ;;  %v4209_v21 = vrot.slane %v4208_v62, 2 }
 0x33e   : > { %v4258_v40 = vsel %vm3237_vm9, %v4193_v23, 0.0  ;;  %v4216_v16 = vrot.slane %v6438_v55, 4 }
 0x33f   : > { %v4222_v25 = vsel %vm3237_vm9, %v4185_v28, 0.0  ;;  %v4092_v17 = vrot.slane %v2462_v37, %v5293_v19 }
 0x340   : > { %v3535_v50 = vpop.permute.xlu1 %3534 }
 0x341   : > { %v4186_v29 = vmul.f32 %v3910_v1, %v3535_v50  ;;  %v3594_v3 = vrot.slane %v3535_v50, %v6269_v56  ;;  %v4099_v20 = vrot.slane %v4092_v17, %v5293_v19  ;;  %v3626_v1 = vrot.slane %v3556_v51, %v6278_v13  ;;  %v4390_v17 = vld [vmem:[%s6641_s5 + $0x10] sm:$0xff] }
 0x342   : > { %v3633_v50 = vsel %vm2522_vm3, %v3586_v32, %v3632_v15 }
 0x343   : > { %v4223_v46 = vsel %vm3241_vm10, %v4186_v29, 0.0  ;;  %v3595_v6 = vsel %vm3330_vm11, %v3594_v3, %v3590_v14  ;;  %v4217_v3 = vadd.f32 %v4216_v16, %v6438_v55 }
 0x344   : > { %v6446_v59 = vadd.f32 %v4223_v46, %v4222_v25  ;;  %v3538_v27 = vpop.permute.xlu1 %3537  ;;  %v3634_v25 = vsel %vm2525_vm4, %v3595_v6, %v3633_v50 }
 0x345   : > { %v4187_v43 = vmul.f32 %v3959_v49, %v3538_v27  ;;  %v4036_v49 = vrot.slane %v4029_v53, %v5293_v19  ;;  %v3599_v19 = vrot.slane %v3538_v27, %v6278_v13  ;;  %v4292_v53 = vld [vmem:[%s6640_s4] sm:$0xff]  ;;  %v4218_v51 = vrot.slane %v4217_v3, 2 }
 0x346   : > { %4917 = vmatpush3.msra.mxu1 %v4292_v53  ;;  %v4225_v7 = vrot.slane %v6446_v59, 4 }
 0x347   : > { %v4231_v22 = vsel %vm3237_vm9, %v4187_v43, 0.0  ;;  %v4219_v55 = vadd.f32 %v4218_v51, %v4217_v3  ;;  %v6773_v51 = vmov 0.0  }
 0x348   : > { %v3541_v5 = vpop.permute.xlu1 %3540 }
 0x349   : > { %v4188_v57 = vmul.f32 %v3973_v8, %v3541_v5  ;;  %v3603_v38 = vrot.slane %v3541_v5, %v6269_v56  ;;  %v6772_v5 = vmov 0.0|0.0   ;;  %v4220_v6 = vrot.slane %v4219_v55, 1 }
 0x34a   : > { %4978 = vmatprep.subr.bf16.mxu1 %v6772_v5 }
 0x34b   : > { %v4232_v18 = vsel %vm3241_vm10, %v4188_v57, 0.0  ;;  %v3604_v4 = vsel %vm3330_vm11, %v3603_v38, %v3599_v19  ;;  %v4388_v57 = vld [vmem:[%s6641_s5] sm:$0xff] }
 0x34c   : > { %v6469_v9 = vadd.f32 %v4232_v18, %v4231_v22  ;;  %v3547_v61 = vpop.permute.xlu1 %3546  ;;  %v3635_v39 = vsel %vm2528_vm5, %v3604_v4, %v3634_v25  ;;  %v4973_v26 = vpack.c.bf16 %v4389_v2, %v4388_v57  ;;  %v4391_v22 = vld [vmem:[%s6641_s5 + $0x18] sm:$0xff] }
 0x34d   : > { %v4190_v36 = vmul.f32 %v4036_v49, %v3547_v61  ;;  %v3612_v41 = vrot.slane %v3547_v61, %v6269_v56  ;;  %v4976_v18 = vpack.c.bf16 %v4391_v22, %v4390_v17  ;;  %v4198_v49 = vrot.slane %v6408_v48, 4 }
 0x34e   : > { %4974 = vmatpush3.bf16.msra.mxu0 %v4973_v26  ;;  %v4234_v61 = vrot.slane %v6469_v9, 4 }
 0x34f   : > { %v4241_v58 = vsel %vm3241_vm10, %v4190_v36, 0.0  ;;  %v3613_v11 = vsel %vm3330_vm11, %v3612_v41, %v3608_v52  ;;  %4975 = vmatprep.subr.bf16.mxu0 %v6772_v5  ;;  %v4199_v36 = vadd.f32 %v4198_v49, %v6408_v48 }
 0x350   : > { %v4242_v31 = vadd.f32 %v4241_v58, %v4240_v45  ;;  %v3553_v44 = vpop.permute.xlu1 %3552  ;;  %v3636_v43 = vsel %vm2531_vm6, %v3613_v11, %v3635_v39  ;;  %v4235_v35 = vadd.f32 %v4234_v61, %v6469_v9 }
 0x351   : > { %v3621_v30 = vrot.slane %v3553_v44, %v6269_v56  ;;  %v4192_v12 = vmul.f32 %v4099_v20, %v3553_v44  ;;  %v4226_v20 = vadd.f32 %v4225_v7, %v6446_v59  ;;  %v4200_v58 = vrot.slane %v4199_v36, 2 }
 0x352   : > { %4977 = vmatpush3.bf16.msra.mxu0 %v4976_v18  ;;  %v4243_v34 = vrot.slane %v4242_v31, 4  ;;  %v4236_v19 = vrot.slane %v4235_v35, 2 }
 0x353   : > { %v4250_v28 = vsel %vm3241_vm10, %v4192_v12, 0.0  ;;  %v3622_v47 = vsel %vm3330_vm11, %v3621_v30, %v3617_v54  ;;  %4984 = vmatprep.subr.bf16.mxu0 %v6772_v5  ;;  %v4227_v14 = vrot.slane %v4226_v20, 2  ;;  %v4201_v63 = vadd.f32 %v4200_v58, %v4199_v36 }
 0x354   : > { %v4251_v29 = vadd.f32 %v4250_v28, %v4249_v42  ;;  %v3559_v24 = vpop.permute.xlu1 %3558  ;;  %v3637_v60 = vsel %vm2534_vm7, %v3622_v47, %v3636_v43  ;;  %v4244_v38 = vadd.f32 %v4243_v34, %v4242_v31  ;;  %v4210_v30 = vadd.f32 %v4209_v21, %v4208_v62 }
 0x355   : > { %v3630_v46 = vrot.slane %v3559_v24, %v6269_v56  ;;  %v4194_v33 = vmul.f32 %v4162_v0, %v3559_v24  ;;  %v4228_v12 = vadd.f32 %v4227_v14, %v4226_v20  ;;  %v4237_v54 = vadd.f32 %v4236_v19, %v4235_v35  ;;  %v4473_v14 = vld [vmem:[%s6643_s7] sm:$0xff]  ;;  %v6774_v19 = vld [vmem:[#allocation7_spill] sm:$0xff] }
 0x356   : > { %v4252_v0 = vrot.slane %v4251_v29, 4  ;;  %v4245_v48 = vrot.slane %v4244_v38, 2  ;;  %v4202_v9 = vrot.slane %v4201_v63, 1  ;;  %v4211_v31 = vrot.slane %v4210_v30, 1 }
 0x357   : > { %v4259_v27 = vsel %vm3241_vm10, %v4194_v33, 0.0  ;;  %v3631_v13 = vsel %vm3330_vm11, %v3630_v46, %v3626_v1  ;;  %v4229_v42 = vrot.slane %v4228_v12, 1  ;;  %v4238_v28 = vrot.slane %v4237_v54, 1 }
 0x358   : > { %v4260_v37 = vadd.f32 %v4259_v27, %v4258_v40  ;;  %v3638_v8 = vsel %vm2537_vm8, %v3631_v13, %v3637_v60  ;;  %v4253_v41 = vadd.f32 %v4252_v0, %v4251_v29  ;;  %v4246_v15 = vadd.f32 %v4245_v48, %v4244_v38 }
 0x359   : > { %v3640_v56 = vsel %vm3403_vm12, %v3638_v8, 0.0  ;;  %v4203_v50 = vadd.f32 %v4202_v9, %v4201_v63  ;;  %v4212_v11 = vadd.f32 %v4211_v31, %v4210_v30  ;;  %v4221_v24 = vadd.f32 %v4220_v6, %v4219_v55  ;;  %v4475_v30 = vld [vmem:[%s6643_s7 + $0x10] sm:$0xff]  ;;  %v4476_v55 = vld [vmem:[%s6643_s7 + $0x18] sm:$0xff] }
 0x35a   : > { %3641 = vadd.xlane.f32.xlu0 %v3640_v56  ;;  %v4261_v45 = vrot.slane %v4260_v37, 4  ;;  %v4254_v59 = vrot.slane %v4253_v41, 2  ;;  %v4247_v1 = vrot.slane %v4246_v15, 1  ;;  %v4230_v25 = vadd.f32 %v4229_v42, %v4228_v12 }
 0x35b   : > { %v4239_v13 = vadd.f32 %v4238_v28, %v4237_v54  ;;  %v4982_v12 = vpack.c.bf16 %v4476_v55, %v4475_v30  ;;  %v4778_v28 = vld [vmem:[%s6644_s8] ss:$0 sm:$0xff] }
 0x35c   : > { %v4262_v44 = vadd.f32 %v4261_v45, %v4260_v37  ;;  %v4255_v23 = vadd.f32 %v4254_v59, %v4253_v41  ;;  %v4248_v43 = vadd.f32 %v4247_v1, %v4246_v15  ;;  %v4474_v41 = vld [vmem:[%s6643_s7 + $0x8] sm:$0xff]  ;;  %v4558_v59 = vld [vmem:[%s6645_s9] sm:$0xff] }
 0x35d   : > { %v4776_v15 = vld [vmem:[%s6642_s6] ss:$0 sm:$0xff] }
 0x35e   : > { %v4263_v52 = vrot.slane %v4262_v44, 2  ;;  %v4256_v46 = vrot.slane %v4255_v23, 1 }
 0x360   : > { %v4264_v4 = vadd.f32 %v4263_v52, %v4262_v44  ;;  %v4257_v2 = vadd.f32 %v4256_v46, %v4255_v23  ;;  %v4979_v44 = vpack.c.bf16 %v4474_v41, %v4473_v14  ;;  %v4559_v52 = vld [vmem:[%s6645_s9 + $0x8] sm:$0xff]  ;;  %v4560_v23 = vld [vmem:[%s6645_s9 + $0x10] sm:$0xff] }
 0x361   : > { %v4985_v54 = vpack.c.bf16 %v4559_v52, %v4558_v59 }
 0x362   : > { %v4265_v33 = vrot.slane %v4264_v4, 1 }
 0x364   : > { %v4266_v17 = vadd.f32 %v4265_v33, %v4264_v4 }
 0x3e7   : > { %v3642_v32 = vpop.xlane.xlu0 %3641 }
 0x3e8   : > { %5076 = vrcp.f32 %v3642_v32 }
 0x3f2   : > { %v5077_v29 = vpop.eup %5076 }
 0x3f3   : > { %v4269_v47 = vrot.slane %v5077_v29, 1  ;;  %v4270_v39 = vrot.slane %v5077_v29, 2  ;;  %v4271_v40 = vrot.slane %v5077_v29, 3  ;;  %v4272_v27 = vrot.slane %v5077_v29, 4 }
 0x3f4   : > { %v4273_v37 = vrot.slane %v5077_v29, 5  ;;  %v4274_v60 = vrot.slane %v5077_v29, 6  ;;  %v4275_v8 = vrot.slane %v5077_v29, 7  ;;  %v4284_v22 = vmul.f32 %v5077_v29, %v4203_v50 }
 0x3f5   : > { %v4285_v56 = vmul.f32 %v4269_v47, %v4212_v11  ;;  %v4286_v53 = vmul.f32 %v4270_v39, %v4221_v24  ;;  %v4287_v57 = vmul.f32 %v4271_v40, %v4230_v25  ;;  %v4288_v26 = vmul.f32 %v4272_v27, %v4239_v13  ;;  %v4780_v24 = vld [vmem:[%s6646_s10] ss:$0 sm:$0xff] }
 0x3f6   : > { %v4289_v18 = vmul.f32 %v4273_v37, %v4248_v43  ;;  %v4290_v16 = vmul.f32 %v4274_v60, %v4257_v2  ;;  %v4291_v7 = vmul.f32 %v4275_v8, %v4266_v17 }
 0x3f7   : > { %v4301_v49 = vrot.slane %v4285_v56, 7  ;;  %v4303_v10 = vrot.slane %v4286_v53, 6  ;;  %v4305_v34 = vrot.slane %v4287_v57, 5  ;;  %v4307_v62 = vrot.slane %v4288_v26, 4 }
 0x3f8   : > { %v4309_v20 = vrot.slane %v4289_v18, 3  ;;  %v4311_v45 = vrot.slane %v4290_v16, 2  ;;  %v4313_v38 = vrot.slane %v4291_v7, 1 }
 0x3f9   : > { %v4302_v61 = vsel %vm2519_vm2, %v4301_v49, %v4284_v22 }
 0x3fa   : > { %v4304_v36 = vsel %vm2522_vm3, %v4303_v10, %v4302_v61 }
 0x3fb   : > { %v4306_v3 = vsel %vm2525_vm4, %v4305_v34, %v4304_v36 }
 0x3fc   : > { %v4308_v0 = vsel %vm2528_vm5, %v4307_v62, %v4306_v3 }
 0x3fd   : > { %v4310_v35 = vsel %vm2531_vm6, %v4309_v20, %v4308_v0 }
 0x3fe   : > { %v4312_v58 = vsel %vm2534_vm7, %v4311_v45, %v4310_v35 }
 0x3ff   : > { %v4314_v21 = vsel %vm2537_vm8, %v4313_v38, %v4312_v58 }
 0x400   : > { %4919 = vmatmul.mubr.msk.f32.vlgmr.msra.gmra.mrb[20].mxu1 %vm3237_vm9, %v4314_v21 }
 0x401   : > { %4940 = vmatprep.mubr.msk.f32.mxu1 %vm5143_vm0, %v6773_v51  ;;  %4980 = vmatpush3.bf16.msra.mxu1 %v4979_v44 }
 0x402   : > { %4981 = vmatprep.subr.bf16.mxu1 %v6772_v5 }
 0x405   : > { %4983 = vmatpush3.bf16.msra.mxu1 %v4982_v12 }
 0x4d3   : > { %v4384_v32 = vpop.f32.mrb[20].mxu1 }
 0x4d4   : > { %v4385_v48 = vadd.f32 %v4384_v32, %v6774_v19  ;;  %v4920_v63 = vpop.f32.mrb[21].mxu1 }
 0x4d6   : > { %4930 = vmatmul.mubr.msk.f32.vlgmr.msra.gmra.mrb[18].mxu0 %vm1371_vm1, %v4385_v48 }
 0x4d7   : > { %4951 = vmatprep.mubr.msk.f32.mxu0 %vm5143_vm0, %v6773_v51  ;;  %4986 = vmatpush3.bf16.msra.mxu0 %v4985_v54 }
 0x4d8   : > { %4987 = vmatprep.subr.bf16.mxu0 %v6772_v5  ;;  %v4561_v5 = vld [vmem:[%s6645_s9 + $0x18] sm:$0xff] }
 0x4d9   : > { %v4988_v4 = vpack.c.bf16 %v4561_v5, %v4560_v23 }
 0x4db   : > { %4989 = vmatpush3.bf16.msra.mxu0 %v4988_v4 }
 0x5a9   : > { %v4468_v9 = vpop.f32.mrb[18].mxu0 }
 0x5aa   : > { %v4469_v31 = vadd.f32 %v4776_v15, %v4468_v9  ;;  %v4931_v6 = vpop.f32.mrb[19].mxu0 }
 0x5ac   : > { %v4472_v42 = vmax.f32 %v4469_v31, 0.0 }
 0x5ae   : > { %4941 = vmatmul.mubr.msk.f32.vlgmr.msra.gmra.mrb[22].mxu1 %vm1371_vm1, %v4472_v42 }
 0x681   : > { %v4553_v1 = vpop.f32.mrb[22].mxu1 }
 0x682   : > { %v4554_v50 = vadd.f32 %v4778_v28, %v4553_v1  ;;  %v4942_v11 = vpop.f32.mrb[23].mxu1 }
 0x684   : > { %v4557_v29 = vadd.f32 %v4554_v50, %v4385_v48 }
 0x686   : > { %4952 = vmatmul.mubr.msk.f32.vlgmr.msra.gmra.mrb[20].mxu0 %vm1371_vm1, %v4557_v29 }
 0x759   : > { %v4638_v25 = vpop.f32.mrb[20].mxu0 }
 0x75a   : > { %v4639_v46 = vadd.f32 %v4780_v24, %v4638_v25  ;;  %v4953_v33 = vpop.f32.mrb[21].mxu0 }
 0x75c   : > { %4642 = vst [vmem:[%s382_s24] sm:$0xff] %v4639_v46 }
 0x75d   : > { %5091 = shalt.err (!%p5088_p3)
}
 0x75e   : > { %s5092_s14 = scalar_lea.hbm %s6594_s13, 128  ;;  %s5096_s29 = scalar_lea.hbm %s6647_s11, 256 }
 0x75f   : > { %p5093_p4 = scmp.ne.s32.totalorder %s6594_s13, %s5092_s14  ;;  %p5097_p9 = scmp.lt.u32.totalorder %s6594_s13, %s6647_s11 }
 0x760   : > { %p5098_p10 = scmp.lt.u32.totalorder %s5096_s29, %s5092_s14  ;;  %p5100_p12 = scmp.lt.u32.totalorder %s5092_s14, %s6594_s13 }
 0x761   : > { %p5094_p7 = pnand %p5093_p4, %p5246_p5 }
 0x762   : > { %p5099_p11 = por %p5098_p10, %p5097_p9 }
 0x763   : > { %p5095_p8 = pneg %p5094_p7 }
 0x764   : > { %p5101_p13 = por %p5100_p12, %p5099_p11 }
 0x766   : > { %p5102_p0 = pnand %p5101_p13, %p5095_p8 }
 0x768   : > { %5105 = shalt.err (!%p5102_p0)
}
 0x769   : > { %4990 = dma.vmem_to_hbm [thread:$0]  (%p5246_p5), %s6596_s25, 128, %s6594_s13, %s4644_s12  }
 0x76a PF: > { %p4996_p1 = scmp.ge.s32.totalorder %s5140_s20, 2  ;;  %s4669_s26 = sand.u32 1, %s5128_s17  }
 0x76b   : > { %s4670_s15 = scalar_lea.sflag [#allocation3], %s4669_s26 }
 0x76c   : > { %p4993_p2 = pnand %p4996_p1, %p5250_p6 }
 0x76e   : > { %5123 = dma.done.wait (!%p4993_p2), %s4670_s15, 128  }
 0x76f   : > { %5125 = vsyncadd (!%p4993_p2), %s4670_s15, 4294967168  ;;  %s6775_s16 = sld [smem:[#allocation5_spill]]  ;;  %p21_p3 = scmp.ge.s32.totalorder %s5233_s23, 4  }
 0x770   : > { %s6776_s17 = smov %s5132_s18  ;;  %s6777_s18 = smov %s5136_s19 }
 0x771   : > { %s6779_s20 = smov %s5233_s23  ;;  %23 = sbr.rel (!%p21_p3) target bundleno = 3 (0x3), region = 99 }
 0x775   : > { %s6778_s19 = smov %s6775_s16 }
 0x778   :  { %4675 = vsyncpa [#allocation3], 1 }
 0x779   :  { %4677 = vsyncpa [#allocation3 + $0x1], 1 }

</bundles_post_ra>
